<compile_context>
chip_gen: v7x
topology: tpu7x:2x2x1
jax: 0.10.0
libtpu: 0.0.40
codegen_flags: <defaults>
</compile_context>

<pallas_src>
import jax
import jax.numpy as jnp
from jax.experimental import pallas as pl
from jax.experimental.pallas import tpu as pltpu


_SMALL_FILL_BYTES = 256 * 1024        # below this, XLA's fused broadcast wins
_BLOCK_BYTE_BUDGET = 4 * 1024 * 1024  # per-buffer; 2x double-buffer << 16 MiB


def _fill_kernel(val_ref, o_ref):
    # val_ref: SMEM scalar holding (sz + 1); o_ref: (TM, n) VMEM output tile.
    o_ref[...] = jnp.full(o_ref.shape, val_ref[0], dtype=o_ref.dtype)


def _pick_row_tile(n: int) -> int:
    """Largest multiple-of-8 row tile whose (TM, n) f32 block fits the budget."""
    row_bytes = n * 4
    tm = max(8, (_BLOCK_BYTE_BUDGET // row_bytes) // 8 * 8)
    if tm >= n:
        return n  # full extent: always legal regardless of n % 8
    return tm     # multiple of 8 (< n) satisfies the (8, 128) block rule


def _pallas_fill(n: int, fill_val: float) -> jax.Array:
    tm = _pick_row_tile(n)
    grid = (pl.cdiv(n, tm),)
    val = jnp.asarray([fill_val], dtype=jnp.float32)
    return pl.pallas_call(
        _fill_kernel,
        out_shape=jax.ShapeDtypeStruct((n, n), jnp.float32),
        grid=grid,
        in_specs=[pl.BlockSpec(memory_space=pltpu.SMEM)],
        out_specs=pl.BlockSpec((tm, n), lambda i: (i, 0)),
        compiler_params=pltpu.CompilerParams(
            dimension_semantics=("parallel",)),
        cost_estimate=pl.CostEstimate(
            flops=0, transcendentals=0, bytes_accessed=n * n * 4 + 4),
    )(val)


def submodule_forward(x):
    """Pallas equivalent of SubModule.forward.

    x: 1-D integer array; x[0] determines both output size and fill value.

    NOTE: the output *shape* depends on a runtime tensor value, so this
    function cannot be called under jax.jit; the device->host read below is
    issued immediately so it overlaps any other host-side work.
    """
    # TODO(synk): data-dependent output shape forces a host sync; no traced
    # equivalent exists in JAX.
    sz = int(jax.device_get(x[0]))
    n = sz if sz % 2 == 0 else sz + 1
    fill_val = float(sz + 1)

    if n * n * 4 < _SMALL_FILL_BYTES:
        # Tiny fill: kernel dispatch + grid overhead would dominate.
        return jnp.full((n, n), fill_val, dtype=jnp.float32)

    return _pallas_fill(n, fill_val)


def _reference(sz: int) -> jax.Array:
    n = sz if sz % 2 == 0 else sz + 1
    return jnp.ones((n, n), dtype=jnp.float32) * (sz + 1)


if __name__ == "__main__":
    key = jax.random.PRNGKey(0)

    # Case 1: small sz (matches the module's typical usage) -> fast path.
    x_small = jax.random.randint(key, (4,), minval=4, maxval=16, dtype=jnp.int32)
    out_small = jax.block_until_ready(submodule_forward(x_small))
    sz_small = int(jax.device_get(x_small[0]))
    exp_small = _reference(sz_small)
    assert out_small.shape == exp_small.shape, (out_small.shape, exp_small.shape)
    assert bool(jnp.all(out_small == exp_small)), "small-case value mismatch"

    # Case 2: odd sz large enough to dispatch the tiled Pallas fill
    # (n = 2048 -> multi-tile grid, lane-dense 2048-wide blocks).
    x_big = jnp.array([2047, 0, 0, 0], dtype=jnp.int32)
    out_big = jax.block_until_ready(submodule_forward(x_big))
    exp_big = _reference(2047)
    assert out_big.shape == exp_big.shape, (out_big.shape, exp_big.shape)
    assert bool(jnp.all(out_big == exp_big)), "large-case value mismatch"

    print("KERNEL_OK")
</pallas_src>

<mosaic_0001>
module attributes {stable_mosaic.version = 11 : i64} {
  func.func @_fill_kernel(%arg0: i32, %arg1: memref<1xf32, #tpu.memory_space<smem>>, %arg2: memref<512x2048xf32, #tpu.memory_space<vmem>>) attributes {dimension_semantics = [#tpu.dimension_semantics<parallel>], iteration_bounds = array<i64: 4>, scalar_prefetch = 0 : i64, scratch_operands = 0 : i64, tpu.core_type = #tpu.core_type<tc>, window_params = [{transform_indices = @transform_0, window_bounds = array<i64: 1>}, {transform_indices = @transform_1, window_bounds = array<i64: 512, 2048>}]} {
    %c0 = arith.constant 0 : index
    %0 = memref.load %arg1[%c0] : memref<1xf32, #tpu.memory_space<smem>>
    %1 = vector.broadcast %0 : f32 to vector<512x2048xf32>
    %c0_0 = arith.constant 0 : index
    %c0_1 = arith.constant 0 : index
    %2 = vector.load %arg2[%c0_0, %c0_1] : memref<512x2048xf32, #tpu.memory_space<vmem>>, vector<512x2048xf32>
    tpu.vector_store %arg2[%c0_0, %c0_1], %1 {strides = array<i32>} : memref<512x2048xf32, #tpu.memory_space<vmem>>, vector<512x2048xf32>,
    return
  }
  func.func @transform_0(%arg0: i32) -> i32 {
    %c0_i32 = arith.constant 0 : i32
    %c0_i32_0 = arith.constant 0 : i32
    return %c0_i32 : i32
  }
  func.func @transform_1(%arg0: i32) -> (i32, i32) {
    %c0_i32 = arith.constant 0 : i32
    %c0_i32_0 = arith.constant 0 : i32
    return %arg0, %c0_i32 : i32, i32
  }
}

</mosaic_0001>

<bundles_post_ra>
// kernel: tpu_custom_call.1
= control target key start
LH: loop header
LB: loop body
LE: loop exit
PB: predicated region body
PF: predicated region fallthrough
CT: control target
= control target key end

     0   :  { %s3476_s0 = inlined_call_operand.<no memory space> [shape: f32[1], index: 0, kind: input, shape index: {}]   ;;  %s3477_s1 = inlined_call_operand.hbm [shape: f32[2048,2048], index: 1, kind: output, shape index: {}]  }
   0x1   :  { %6 = sst [smem:[#allocation2]] %s3476_s0 }
   0x2   :  { %7 = vsyncpa [#allocation4], 0 }
   0x3   :  { %9 = vsyncpa [#allocation4 + $0x1], 0  ;;  %s1322_s8 = smov 0   ;;  %s1324_s9 = smov 0  }
   0x4   :  { %s1326_s10 = smov 0   ;;  %s1328_s11 = smov 0  }
   0x5 LB: > { %s1187_s0 = sadd.s32 4294967295, %s1304_s11   ;;  %s1188_s12 = sadd.s32 4294967294, %s1304_s11   ;;  %s1304_s11 = sphi %s1328_s11, %s3483_s11   ;;  %s1300_s10 = sphi %s1326_s10, %s3482_s10   ;;  %s1296_s9 = sphi %s1324_s9, %s3481_s9   ;;  %s1292_s8 = sphi %s1322_s8, %s3480_s8  }
   0x6   : > { %s1345_s13 = sadd.s32 1, %s1304_s11   ;;  %s43_s14 = sadd.s32 1, %s1300_s10 }
   0x7   : > { %s40_s15 = ssub.s32 %s1304_s11, %s1345_s13  ;;  %p53_p0 = scmp.ne.s32.totalorder %s1300_s10, %s1296_s9 }
   0x8   : > { %p41_p1 = scmp.eq.s32.totalorder %s40_s15, 0  ;;  %p54_p2 = scmp.eq.s32.totalorder %s1187_s0, 3 }
   0x9   : > { %p59_p3 = scmp.ne.s32.totalorder %s1296_s9, %s1292_s8  ;;  %p60_p4 = scmp.eq.s32.totalorder %s1188_s12, 3 }
   0xa   : > { %s1355_s16 = scalar_select %p41_p1, %s1300_s10, %s43_s14  }
   0xb   : > { %p1357_p5 = por %p54_p2, %p53_p0  ;;  %p1361_p6 = por %p60_p4, %p59_p3 }
   0xc   : > { %p1190_p7 = scmp.ge.s32.totalorder %s1304_s11, 1  ;;  %p81_p8 = scmp.lt.s32.totalorder %s1304_s11, 5 }
   0xe   : > { %p82_p9 = pnand %p1190_p7, %p81_p8 }
   0xf   : > { %s93_s19 = sand.u32 (!%p82_p9), 1, %s1296_s9   ;;  %s97_s20 = sld [smem:[#allocation2]] (!%p82_p9) }
  0x10   : > { %85 = sbr.rel (%p82_p9) target bundleno = 548 (0x224), region = 24  ;;  %s1191_s21 = sshll.u32 (!%p82_p9), %s93_s19, 13 }
  0x11   : > { %s1199_s22 = sshll.u32 (!%p82_p9), %s1187_s0, 17  ;;  %s1370_s23 = scalar_lea.vmem (!%p82_p9), [#allocation3], %s1191_s21 }
  0x12   : > { %s1138_s24 = sshll.u32 (!%p82_p9), %s1370_s23, 4  ;;  %s1376_s27 = scalar_lea.hbm (!%p82_p9), %s3477_s1, %s1199_s22  ;;  %s1378_s24 = int_to_ptr.vmem [resolvable:$true] %s1138_s24 }
  0x13   : > { %s3435_s28 = scalar_lea.sflag (!%p82_p9), [#allocation4], %s93_s19  ;;  %s1242_s29 = scalar_lea.vmem (!%p82_p9), %s1378_s24, 131072 }
  0x14   : > { %p1243_p10 = scmp.ne.s32.totalorder (!%p82_p9), %s1378_s24, %s1242_s29  ;;  %s1306_s30 = smov (!%p82_p9), [#allocation3]  }
  0x15   : > { %v1380_v0 = vstv (!%p82_p9), %s97_s20  ;;  %s1246_s2 = sshll.u32 (!%p82_p9), %s1306_s30, 4  ;;  %s1247_s2 = int_to_ptr.vmem [resolvable:$false] %s1246_s2 }
  0x16   : > { %99 = vst [vmem:[%s1370_s23] sm:$0xff] (!%p82_p9), %v1380_v0  ;;  %100 = vst [vmem:[%s1370_s23 + $0x8] sm:$0xff] (!%p82_p9), %v1380_v0  ;;  %p1244_p11 = pnand (!%p82_p9), %p1243_p10, %p1357_p5  ;;  %s1248_s3 = scalar_lea.vmem (!%p82_p9), %s1247_s2, 262144 }
  0x17   : > { %101 = vst [vmem:[%s1370_s23 + $0x10] sm:$0xff] %v1380_v0  ;;  %102 = vst [vmem:[%s1370_s23 + $0x18] sm:$0xff] %v1380_v0  ;;  %p1249_p13 = scmp.lt.s32.totalorder %s1378_s24, %s1247_s2  ;;  %p1250_p0 = scmp.lt.s32.totalorder %s1248_s3, %s1242_s29 }
  0x18   : > { %103 = vst [vmem:[%s1370_s23 + $0x20] sm:$0xff] %v1380_v0  ;;  %104 = vst [vmem:[%s1370_s23 + $0x28] sm:$0xff] %v1380_v0  ;;  %p1245_p12 = pneg %p1244_p11 }
  0x19   : > { %105 = vst [vmem:[%s1370_s23 + $0x30] sm:$0xff] %v1380_v0  ;;  %106 = vst [vmem:[%s1370_s23 + $0x38] sm:$0xff] %v1380_v0  ;;  %p1251_p1 = por %p1250_p0, %p1249_p13 }
  0x1a   : > { %107 = vst [vmem:[%s1370_s23 + $0x40] sm:$0xff] %v1380_v0  ;;  %108 = vst [vmem:[%s1370_s23 + $0x48] sm:$0xff] %v1380_v0 }
  0x1b   : > { %109 = vst [vmem:[%s1370_s23 + $0x50] sm:$0xff] %v1380_v0  ;;  %110 = vst [vmem:[%s1370_s23 + $0x58] sm:$0xff] %v1380_v0  ;;  %p1252_p2 = pnand %p1251_p1, %p1245_p12 }
  0x1c   : > { %111 = vst [vmem:[%s1370_s23 + $0x60] sm:$0xff] %v1380_v0  ;;  %112 = vst [vmem:[%s1370_s23 + $0x68] sm:$0xff] %v1380_v0 }
  0x1d   : > { %113 = vst [vmem:[%s1370_s23 + $0x70] sm:$0xff] %v1380_v0  ;;  %114 = vst [vmem:[%s1370_s23 + $0x78] sm:$0xff] %v1380_v0  ;;  %v2407_v1 = vld [vmem:[%s1370_s23] sm:$0xff] }
  0x1e   : > { %115 = vst [vmem:[%s1370_s23 + $0x80] sm:$0xff] %v1380_v0  ;;  %116 = vst [vmem:[%s1370_s23 + $0x88] sm:$0xff] %v1380_v0 }
  0x1f   : > { %117 = vst [vmem:[%s1370_s23 + $0x90] sm:$0xff] %v1380_v0  ;;  %118 = vst [vmem:[%s1370_s23 + $0x98] sm:$0xff] %v1380_v0 }
  0x20   : > { %119 = vst [vmem:[%s1370_s23 + $0xa0] sm:$0xff] %v1380_v0  ;;  %120 = vst [vmem:[%s1370_s23 + $0xa8] sm:$0xff] %v1380_v0 }
  0x21   : > { %121 = vst [vmem:[%s1370_s23 + $0xb0] sm:$0xff] %v1380_v0  ;;  %122 = vst [vmem:[%s1370_s23 + $0xb8] sm:$0xff] %v1380_v0 }
  0x22   : > { %123 = vst [vmem:[%s1370_s23 + $0xc0] sm:$0xff] %v1380_v0  ;;  %124 = vst [vmem:[%s1370_s23 + $0xc8] sm:$0xff] %v1380_v0 }
  0x23   : > { %125 = vst [vmem:[%s1370_s23 + $0xd0] sm:$0xff] %v1380_v0  ;;  %126 = vst [vmem:[%s1370_s23 + $0xd8] sm:$0xff] %v1380_v0 }
  0x24   : > { %127 = vst [vmem:[%s1370_s23 + $0xe0] sm:$0xff] %v1380_v0  ;;  %128 = vst [vmem:[%s1370_s23 + $0xe8] sm:$0xff] %v1380_v0 }
  0x25   : > { %129 = vst [vmem:[%s1370_s23 + $0xf0] sm:$0xff] %v1380_v0  ;;  %130 = vst [vmem:[%s1370_s23 + $0xf8] sm:$0xff] %v1380_v0 }
  0x26   : > { %131 = vst [vmem:[%s1370_s23 + $0x100] sm:$0xff] %v1380_v0  ;;  %132 = vst [vmem:[%s1370_s23 + $0x108] sm:$0xff] %v1380_v0 }
  0x27   : > { %133 = vst [vmem:[%s1370_s23 + $0x110] sm:$0xff] %v1380_v0  ;;  %134 = vst [vmem:[%s1370_s23 + $0x118] sm:$0xff] %v1380_v0 }
  0x28   : > { %135 = vst [vmem:[%s1370_s23 + $0x120] sm:$0xff] %v1380_v0  ;;  %136 = vst [vmem:[%s1370_s23 + $0x128] sm:$0xff] %v1380_v0 }
  0x29   : > { %137 = vst [vmem:[%s1370_s23 + $0x130] sm:$0xff] %v1380_v0  ;;  %138 = vst [vmem:[%s1370_s23 + $0x138] sm:$0xff] %v1380_v0 }
  0x2a   : > { %139 = vst [vmem:[%s1370_s23 + $0x140] sm:$0xff] %v1380_v0  ;;  %140 = vst [vmem:[%s1370_s23 + $0x148] sm:$0xff] %v1380_v0 }
  0x2b   : > { %141 = vst [vmem:[%s1370_s23 + $0x150] sm:$0xff] %v1380_v0  ;;  %142 = vst [vmem:[%s1370_s23 + $0x158] sm:$0xff] %v1380_v0 }
  0x2c   : > { %143 = vst [vmem:[%s1370_s23 + $0x160] sm:$0xff] %v1380_v0  ;;  %144 = vst [vmem:[%s1370_s23 + $0x168] sm:$0xff] %v1380_v0 }
  0x2d   : > { %145 = vst [vmem:[%s1370_s23 + $0x170] sm:$0xff] %v1380_v0  ;;  %146 = vst [vmem:[%s1370_s23 + $0x178] sm:$0xff] %v1380_v0 }
  0x2e   : > { %147 = vst [vmem:[%s1370_s23 + $0x180] sm:$0xff] %v1380_v0  ;;  %148 = vst [vmem:[%s1370_s23 + $0x188] sm:$0xff] %v1380_v0 }
  0x2f   : > { %149 = vst [vmem:[%s1370_s23 + $0x190] sm:$0xff] %v1380_v0  ;;  %150 = vst [vmem:[%s1370_s23 + $0x198] sm:$0xff] %v1380_v0 }
  0x30   : > { %151 = vst [vmem:[%s1370_s23 + $0x1a0] sm:$0xff] %v1380_v0  ;;  %152 = vst [vmem:[%s1370_s23 + $0x1a8] sm:$0xff] %v1380_v0 }
  0x31   : > { %153 = vst [vmem:[%s1370_s23 + $0x1b0] sm:$0xff] %v1380_v0  ;;  %154 = vst [vmem:[%s1370_s23 + $0x1b8] sm:$0xff] %v1380_v0 }
  0x32   : > { %155 = vst [vmem:[%s1370_s23 + $0x1c0] sm:$0xff] %v1380_v0  ;;  %156 = vst [vmem:[%s1370_s23 + $0x1c8] sm:$0xff] %v1380_v0 }
  0x33   : > { %157 = vst [vmem:[%s1370_s23 + $0x1d0] sm:$0xff] %v1380_v0  ;;  %158 = vst [vmem:[%s1370_s23 + $0x1d8] sm:$0xff] %v1380_v0 }
  0x34   : > { %159 = vst [vmem:[%s1370_s23 + $0x1e0] sm:$0xff] %v1380_v0  ;;  %160 = vst [vmem:[%s1370_s23 + $0x1e8] sm:$0xff] %v1380_v0 }
  0x35   : > { %161 = vst [vmem:[%s1370_s23 + $0x1f0] sm:$0xff] %v1380_v0  ;;  %162 = vst [vmem:[%s1370_s23 + $0x1f8] sm:$0xff] %v1380_v0 }
  0x36   : > { %163 = vst [vmem:[%s1370_s23 + $0x200] sm:$0xff] %v1380_v0  ;;  %164 = vst [vmem:[%s1370_s23 + $0x208] sm:$0xff] %v1380_v0 }
  0x37   : > { %165 = vst [vmem:[%s1370_s23 + $0x210] sm:$0xff] %v1380_v0  ;;  %166 = vst [vmem:[%s1370_s23 + $0x218] sm:$0xff] %v1380_v0 }
  0x38   : > { %167 = vst [vmem:[%s1370_s23 + $0x220] sm:$0xff] %v1380_v0  ;;  %168 = vst [vmem:[%s1370_s23 + $0x228] sm:$0xff] %v1380_v0 }
  0x39   : > { %169 = vst [vmem:[%s1370_s23 + $0x230] sm:$0xff] %v1380_v0  ;;  %170 = vst [vmem:[%s1370_s23 + $0x238] sm:$0xff] %v1380_v0 }
  0x3a   : > { %171 = vst [vmem:[%s1370_s23 + $0x240] sm:$0xff] %v1380_v0  ;;  %172 = vst [vmem:[%s1370_s23 + $0x248] sm:$0xff] %v1380_v0 }
  0x3b   : > { %173 = vst [vmem:[%s1370_s23 + $0x250] sm:$0xff] %v1380_v0  ;;  %174 = vst [vmem:[%s1370_s23 + $0x258] sm:$0xff] %v1380_v0 }
  0x3c   : > { %175 = vst [vmem:[%s1370_s23 + $0x260] sm:$0xff] %v1380_v0  ;;  %176 = vst [vmem:[%s1370_s23 + $0x268] sm:$0xff] %v1380_v0 }
  0x3d   : > { %177 = vst [vmem:[%s1370_s23 + $0x270] sm:$0xff] %v1380_v0  ;;  %178 = vst [vmem:[%s1370_s23 + $0x278] sm:$0xff] %v1380_v0 }
  0x3e   : > { %179 = vst [vmem:[%s1370_s23 + $0x280] sm:$0xff] %v1380_v0  ;;  %180 = vst [vmem:[%s1370_s23 + $0x288] sm:$0xff] %v1380_v0 }
  0x3f   : > { %181 = vst [vmem:[%s1370_s23 + $0x290] sm:$0xff] %v1380_v0  ;;  %182 = vst [vmem:[%s1370_s23 + $0x298] sm:$0xff] %v1380_v0 }
  0x40   : > { %183 = vst [vmem:[%s1370_s23 + $0x2a0] sm:$0xff] %v1380_v0  ;;  %184 = vst [vmem:[%s1370_s23 + $0x2a8] sm:$0xff] %v1380_v0 }
  0x41   : > { %185 = vst [vmem:[%s1370_s23 + $0x2b0] sm:$0xff] %v1380_v0  ;;  %186 = vst [vmem:[%s1370_s23 + $0x2b8] sm:$0xff] %v1380_v0 }
  0x42   : > { %187 = vst [vmem:[%s1370_s23 + $0x2c0] sm:$0xff] %v1380_v0  ;;  %188 = vst [vmem:[%s1370_s23 + $0x2c8] sm:$0xff] %v1380_v0 }
  0x43   : > { %189 = vst [vmem:[%s1370_s23 + $0x2d0] sm:$0xff] %v1380_v0  ;;  %190 = vst [vmem:[%s1370_s23 + $0x2d8] sm:$0xff] %v1380_v0 }
  0x44   : > { %191 = vst [vmem:[%s1370_s23 + $0x2e0] sm:$0xff] %v1380_v0  ;;  %192 = vst [vmem:[%s1370_s23 + $0x2e8] sm:$0xff] %v1380_v0 }
  0x45   : > { %193 = vst [vmem:[%s1370_s23 + $0x2f0] sm:$0xff] %v1380_v0  ;;  %194 = vst [vmem:[%s1370_s23 + $0x2f8] sm:$0xff] %v1380_v0 }
  0x46   : > { %195 = vst [vmem:[%s1370_s23 + $0x300] sm:$0xff] %v1380_v0  ;;  %196 = vst [vmem:[%s1370_s23 + $0x308] sm:$0xff] %v1380_v0 }
  0x47   : > { %197 = vst [vmem:[%s1370_s23 + $0x310] sm:$0xff] %v1380_v0  ;;  %198 = vst [vmem:[%s1370_s23 + $0x318] sm:$0xff] %v1380_v0 }
  0x48   : > { %199 = vst [vmem:[%s1370_s23 + $0x320] sm:$0xff] %v1380_v0  ;;  %200 = vst [vmem:[%s1370_s23 + $0x328] sm:$0xff] %v1380_v0 }
  0x49   : > { %201 = vst [vmem:[%s1370_s23 + $0x330] sm:$0xff] %v1380_v0  ;;  %202 = vst [vmem:[%s1370_s23 + $0x338] sm:$0xff] %v1380_v0 }
  0x4a   : > { %203 = vst [vmem:[%s1370_s23 + $0x340] sm:$0xff] %v1380_v0  ;;  %204 = vst [vmem:[%s1370_s23 + $0x348] sm:$0xff] %v1380_v0 }
  0x4b   : > { %205 = vst [vmem:[%s1370_s23 + $0x350] sm:$0xff] %v1380_v0  ;;  %206 = vst [vmem:[%s1370_s23 + $0x358] sm:$0xff] %v1380_v0 }
  0x4c   : > { %207 = vst [vmem:[%s1370_s23 + $0x360] sm:$0xff] %v1380_v0  ;;  %208 = vst [vmem:[%s1370_s23 + $0x368] sm:$0xff] %v1380_v0 }
  0x4d   : > { %209 = vst [vmem:[%s1370_s23 + $0x370] sm:$0xff] %v1380_v0  ;;  %210 = vst [vmem:[%s1370_s23 + $0x378] sm:$0xff] %v1380_v0 }
  0x4e   : > { %211 = vst [vmem:[%s1370_s23 + $0x380] sm:$0xff] %v1380_v0  ;;  %212 = vst [vmem:[%s1370_s23 + $0x388] sm:$0xff] %v1380_v0 }
  0x4f   : > { %213 = vst [vmem:[%s1370_s23 + $0x390] sm:$0xff] %v1380_v0  ;;  %214 = vst [vmem:[%s1370_s23 + $0x398] sm:$0xff] %v1380_v0 }
  0x50   : > { %215 = vst [vmem:[%s1370_s23 + $0x3a0] sm:$0xff] %v1380_v0  ;;  %216 = vst [vmem:[%s1370_s23 + $0x3a8] sm:$0xff] %v1380_v0 }
  0x51   : > { %217 = vst [vmem:[%s1370_s23 + $0x3b0] sm:$0xff] %v1380_v0  ;;  %218 = vst [vmem:[%s1370_s23 + $0x3b8] sm:$0xff] %v1380_v0 }
  0x52   : > { %219 = vst [vmem:[%s1370_s23 + $0x3c0] sm:$0xff] %v1380_v0  ;;  %220 = vst [vmem:[%s1370_s23 + $0x3c8] sm:$0xff] %v1380_v0 }
  0x53   : > { %221 = vst [vmem:[%s1370_s23 + $0x3d0] sm:$0xff] %v1380_v0  ;;  %222 = vst [vmem:[%s1370_s23 + $0x3d8] sm:$0xff] %v1380_v0 }
  0x54   : > { %223 = vst [vmem:[%s1370_s23 + $0x3e0] sm:$0xff] %v1380_v0  ;;  %224 = vst [vmem:[%s1370_s23 + $0x3e8] sm:$0xff] %v1380_v0 }
  0x55   : > { %225 = vst [vmem:[%s1370_s23 + $0x3f0] sm:$0xff] %v1380_v0  ;;  %226 = vst [vmem:[%s1370_s23 + $0x3f8] sm:$0xff] %v1380_v0 }
  0x56   : > { %227 = vst [vmem:[%s1370_s23 + $0x400] sm:$0xff] %v1380_v0  ;;  %228 = vst [vmem:[%s1370_s23 + $0x408] sm:$0xff] %v1380_v0 }
  0x57   : > { %229 = vst [vmem:[%s1370_s23 + $0x410] sm:$0xff] %v1380_v0  ;;  %230 = vst [vmem:[%s1370_s23 + $0x418] sm:$0xff] %v1380_v0 }
  0x58   : > { %231 = vst [vmem:[%s1370_s23 + $0x420] sm:$0xff] %v1380_v0  ;;  %232 = vst [vmem:[%s1370_s23 + $0x428] sm:$0xff] %v1380_v0 }
  0x59   : > { %233 = vst [vmem:[%s1370_s23 + $0x430] sm:$0xff] %v1380_v0  ;;  %234 = vst [vmem:[%s1370_s23 + $0x438] sm:$0xff] %v1380_v0 }
  0x5a   : > { %235 = vst [vmem:[%s1370_s23 + $0x440] sm:$0xff] %v1380_v0  ;;  %236 = vst [vmem:[%s1370_s23 + $0x448] sm:$0xff] %v1380_v0 }
  0x5b   : > { %237 = vst [vmem:[%s1370_s23 + $0x450] sm:$0xff] %v1380_v0  ;;  %238 = vst [vmem:[%s1370_s23 + $0x458] sm:$0xff] %v1380_v0 }
  0x5c   : > { %239 = vst [vmem:[%s1370_s23 + $0x460] sm:$0xff] %v1380_v0  ;;  %240 = vst [vmem:[%s1370_s23 + $0x468] sm:$0xff] %v1380_v0 }
  0x5d   : > { %241 = vst [vmem:[%s1370_s23 + $0x470] sm:$0xff] %v1380_v0  ;;  %242 = vst [vmem:[%s1370_s23 + $0x478] sm:$0xff] %v1380_v0 }
  0x5e   : > { %243 = vst [vmem:[%s1370_s23 + $0x480] sm:$0xff] %v1380_v0  ;;  %244 = vst [vmem:[%s1370_s23 + $0x488] sm:$0xff] %v1380_v0 }
  0x5f   : > { %245 = vst [vmem:[%s1370_s23 + $0x490] sm:$0xff] %v1380_v0  ;;  %246 = vst [vmem:[%s1370_s23 + $0x498] sm:$0xff] %v1380_v0 }
  0x60   : > { %247 = vst [vmem:[%s1370_s23 + $0x4a0] sm:$0xff] %v1380_v0  ;;  %248 = vst [vmem:[%s1370_s23 + $0x4a8] sm:$0xff] %v1380_v0 }
  0x61   : > { %249 = vst [vmem:[%s1370_s23 + $0x4b0] sm:$0xff] %v1380_v0  ;;  %250 = vst [vmem:[%s1370_s23 + $0x4b8] sm:$0xff] %v1380_v0 }
  0x62   : > { %251 = vst [vmem:[%s1370_s23 + $0x4c0] sm:$0xff] %v1380_v0  ;;  %252 = vst [vmem:[%s1370_s23 + $0x4c8] sm:$0xff] %v1380_v0 }
  0x63   : > { %253 = vst [vmem:[%s1370_s23 + $0x4d0] sm:$0xff] %v1380_v0  ;;  %254 = vst [vmem:[%s1370_s23 + $0x4d8] sm:$0xff] %v1380_v0 }
  0x64   : > { %255 = vst [vmem:[%s1370_s23 + $0x4e0] sm:$0xff] %v1380_v0  ;;  %256 = vst [vmem:[%s1370_s23 + $0x4e8] sm:$0xff] %v1380_v0 }
  0x65   : > { %257 = vst [vmem:[%s1370_s23 + $0x4f0] sm:$0xff] %v1380_v0  ;;  %258 = vst [vmem:[%s1370_s23 + $0x4f8] sm:$0xff] %v1380_v0 }
  0x66   : > { %259 = vst [vmem:[%s1370_s23 + $0x500] sm:$0xff] %v1380_v0  ;;  %260 = vst [vmem:[%s1370_s23 + $0x508] sm:$0xff] %v1380_v0 }
  0x67   : > { %261 = vst [vmem:[%s1370_s23 + $0x510] sm:$0xff] %v1380_v0  ;;  %262 = vst [vmem:[%s1370_s23 + $0x518] sm:$0xff] %v1380_v0 }
  0x68   : > { %263 = vst [vmem:[%s1370_s23 + $0x520] sm:$0xff] %v1380_v0  ;;  %264 = vst [vmem:[%s1370_s23 + $0x528] sm:$0xff] %v1380_v0 }
  0x69   : > { %265 = vst [vmem:[%s1370_s23 + $0x530] sm:$0xff] %v1380_v0  ;;  %266 = vst [vmem:[%s1370_s23 + $0x538] sm:$0xff] %v1380_v0 }
  0x6a   : > { %267 = vst [vmem:[%s1370_s23 + $0x540] sm:$0xff] %v1380_v0  ;;  %268 = vst [vmem:[%s1370_s23 + $0x548] sm:$0xff] %v1380_v0 }
  0x6b   : > { %269 = vst [vmem:[%s1370_s23 + $0x550] sm:$0xff] %v1380_v0  ;;  %270 = vst [vmem:[%s1370_s23 + $0x558] sm:$0xff] %v1380_v0 }
  0x6c   : > { %271 = vst [vmem:[%s1370_s23 + $0x560] sm:$0xff] %v1380_v0  ;;  %272 = vst [vmem:[%s1370_s23 + $0x568] sm:$0xff] %v1380_v0 }
  0x6d   : > { %273 = vst [vmem:[%s1370_s23 + $0x570] sm:$0xff] %v1380_v0  ;;  %274 = vst [vmem:[%s1370_s23 + $0x578] sm:$0xff] %v1380_v0 }
  0x6e   : > { %275 = vst [vmem:[%s1370_s23 + $0x580] sm:$0xff] %v1380_v0  ;;  %276 = vst [vmem:[%s1370_s23 + $0x588] sm:$0xff] %v1380_v0 }
  0x6f   : > { %277 = vst [vmem:[%s1370_s23 + $0x590] sm:$0xff] %v1380_v0  ;;  %278 = vst [vmem:[%s1370_s23 + $0x598] sm:$0xff] %v1380_v0 }
  0x70   : > { %279 = vst [vmem:[%s1370_s23 + $0x5a0] sm:$0xff] %v1380_v0  ;;  %280 = vst [vmem:[%s1370_s23 + $0x5a8] sm:$0xff] %v1380_v0 }
  0x71   : > { %281 = vst [vmem:[%s1370_s23 + $0x5b0] sm:$0xff] %v1380_v0  ;;  %282 = vst [vmem:[%s1370_s23 + $0x5b8] sm:$0xff] %v1380_v0 }
  0x72   : > { %283 = vst [vmem:[%s1370_s23 + $0x5c0] sm:$0xff] %v1380_v0  ;;  %284 = vst [vmem:[%s1370_s23 + $0x5c8] sm:$0xff] %v1380_v0 }
  0x73   : > { %285 = vst [vmem:[%s1370_s23 + $0x5d0] sm:$0xff] %v1380_v0  ;;  %286 = vst [vmem:[%s1370_s23 + $0x5d8] sm:$0xff] %v1380_v0 }
  0x74   : > { %287 = vst [vmem:[%s1370_s23 + $0x5e0] sm:$0xff] %v1380_v0  ;;  %288 = vst [vmem:[%s1370_s23 + $0x5e8] sm:$0xff] %v1380_v0 }
  0x75   : > { %289 = vst [vmem:[%s1370_s23 + $0x5f0] sm:$0xff] %v1380_v0  ;;  %290 = vst [vmem:[%s1370_s23 + $0x5f8] sm:$0xff] %v1380_v0 }
  0x76   : > { %291 = vst [vmem:[%s1370_s23 + $0x600] sm:$0xff] %v1380_v0  ;;  %292 = vst [vmem:[%s1370_s23 + $0x608] sm:$0xff] %v1380_v0 }
  0x77   : > { %293 = vst [vmem:[%s1370_s23 + $0x610] sm:$0xff] %v1380_v0  ;;  %294 = vst [vmem:[%s1370_s23 + $0x618] sm:$0xff] %v1380_v0 }
  0x78   : > { %295 = vst [vmem:[%s1370_s23 + $0x620] sm:$0xff] %v1380_v0  ;;  %296 = vst [vmem:[%s1370_s23 + $0x628] sm:$0xff] %v1380_v0 }
  0x79   : > { %297 = vst [vmem:[%s1370_s23 + $0x630] sm:$0xff] %v1380_v0  ;;  %298 = vst [vmem:[%s1370_s23 + $0x638] sm:$0xff] %v1380_v0 }
  0x7a   : > { %299 = vst [vmem:[%s1370_s23 + $0x640] sm:$0xff] %v1380_v0  ;;  %300 = vst [vmem:[%s1370_s23 + $0x648] sm:$0xff] %v1380_v0 }
  0x7b   : > { %301 = vst [vmem:[%s1370_s23 + $0x650] sm:$0xff] %v1380_v0  ;;  %302 = vst [vmem:[%s1370_s23 + $0x658] sm:$0xff] %v1380_v0 }
  0x7c   : > { %303 = vst [vmem:[%s1370_s23 + $0x660] sm:$0xff] %v1380_v0  ;;  %304 = vst [vmem:[%s1370_s23 + $0x668] sm:$0xff] %v1380_v0 }
  0x7d   : > { %305 = vst [vmem:[%s1370_s23 + $0x670] sm:$0xff] %v1380_v0  ;;  %306 = vst [vmem:[%s1370_s23 + $0x678] sm:$0xff] %v1380_v0 }
  0x7e   : > { %307 = vst [vmem:[%s1370_s23 + $0x680] sm:$0xff] %v1380_v0  ;;  %308 = vst [vmem:[%s1370_s23 + $0x688] sm:$0xff] %v1380_v0 }
  0x7f   : > { %309 = vst [vmem:[%s1370_s23 + $0x690] sm:$0xff] %v1380_v0  ;;  %310 = vst [vmem:[%s1370_s23 + $0x698] sm:$0xff] %v1380_v0 }
  0x80   : > { %311 = vst [vmem:[%s1370_s23 + $0x6a0] sm:$0xff] %v1380_v0  ;;  %312 = vst [vmem:[%s1370_s23 + $0x6a8] sm:$0xff] %v1380_v0 }
  0x81   : > { %313 = vst [vmem:[%s1370_s23 + $0x6b0] sm:$0xff] %v1380_v0  ;;  %314 = vst [vmem:[%s1370_s23 + $0x6b8] sm:$0xff] %v1380_v0 }
  0x82   : > { %315 = vst [vmem:[%s1370_s23 + $0x6c0] sm:$0xff] %v1380_v0  ;;  %316 = vst [vmem:[%s1370_s23 + $0x6c8] sm:$0xff] %v1380_v0 }
  0x83   : > { %317 = vst [vmem:[%s1370_s23 + $0x6d0] sm:$0xff] %v1380_v0  ;;  %318 = vst [vmem:[%s1370_s23 + $0x6d8] sm:$0xff] %v1380_v0 }
  0x84   : > { %319 = vst [vmem:[%s1370_s23 + $0x6e0] sm:$0xff] %v1380_v0  ;;  %320 = vst [vmem:[%s1370_s23 + $0x6e8] sm:$0xff] %v1380_v0 }
  0x85   : > { %321 = vst [vmem:[%s1370_s23 + $0x6f0] sm:$0xff] %v1380_v0  ;;  %322 = vst [vmem:[%s1370_s23 + $0x6f8] sm:$0xff] %v1380_v0 }
  0x86   : > { %323 = vst [vmem:[%s1370_s23 + $0x700] sm:$0xff] %v1380_v0  ;;  %324 = vst [vmem:[%s1370_s23 + $0x708] sm:$0xff] %v1380_v0 }
  0x87   : > { %325 = vst [vmem:[%s1370_s23 + $0x710] sm:$0xff] %v1380_v0  ;;  %326 = vst [vmem:[%s1370_s23 + $0x718] sm:$0xff] %v1380_v0 }
  0x88   : > { %327 = vst [vmem:[%s1370_s23 + $0x720] sm:$0xff] %v1380_v0  ;;  %328 = vst [vmem:[%s1370_s23 + $0x728] sm:$0xff] %v1380_v0 }
  0x89   : > { %329 = vst [vmem:[%s1370_s23 + $0x730] sm:$0xff] %v1380_v0  ;;  %330 = vst [vmem:[%s1370_s23 + $0x738] sm:$0xff] %v1380_v0 }
  0x8a   : > { %331 = vst [vmem:[%s1370_s23 + $0x740] sm:$0xff] %v1380_v0  ;;  %332 = vst [vmem:[%s1370_s23 + $0x748] sm:$0xff] %v1380_v0 }
  0x8b   : > { %333 = vst [vmem:[%s1370_s23 + $0x750] sm:$0xff] %v1380_v0  ;;  %334 = vst [vmem:[%s1370_s23 + $0x758] sm:$0xff] %v1380_v0 }
  0x8c   : > { %335 = vst [vmem:[%s1370_s23 + $0x760] sm:$0xff] %v1380_v0  ;;  %336 = vst [vmem:[%s1370_s23 + $0x768] sm:$0xff] %v1380_v0 }
  0x8d   : > { %337 = vst [vmem:[%s1370_s23 + $0x770] sm:$0xff] %v1380_v0  ;;  %338 = vst [vmem:[%s1370_s23 + $0x778] sm:$0xff] %v1380_v0 }
  0x8e   : > { %339 = vst [vmem:[%s1370_s23 + $0x780] sm:$0xff] %v1380_v0  ;;  %340 = vst [vmem:[%s1370_s23 + $0x788] sm:$0xff] %v1380_v0 }
  0x8f   : > { %341 = vst [vmem:[%s1370_s23 + $0x790] sm:$0xff] %v1380_v0  ;;  %342 = vst [vmem:[%s1370_s23 + $0x798] sm:$0xff] %v1380_v0 }
  0x90   : > { %343 = vst [vmem:[%s1370_s23 + $0x7a0] sm:$0xff] %v1380_v0  ;;  %344 = vst [vmem:[%s1370_s23 + $0x7a8] sm:$0xff] %v1380_v0 }
  0x91   : > { %345 = vst [vmem:[%s1370_s23 + $0x7b0] sm:$0xff] %v1380_v0  ;;  %346 = vst [vmem:[%s1370_s23 + $0x7b8] sm:$0xff] %v1380_v0 }
  0x92   : > { %347 = vst [vmem:[%s1370_s23 + $0x7c0] sm:$0xff] %v1380_v0  ;;  %348 = vst [vmem:[%s1370_s23 + $0x7c8] sm:$0xff] %v1380_v0 }
  0x93   : > { %349 = vst [vmem:[%s1370_s23 + $0x7d0] sm:$0xff] %v1380_v0  ;;  %350 = vst [vmem:[%s1370_s23 + $0x7d8] sm:$0xff] %v1380_v0 }
  0x94   : > { %351 = vst [vmem:[%s1370_s23 + $0x7e0] sm:$0xff] %v1380_v0  ;;  %352 = vst [vmem:[%s1370_s23 + $0x7e8] sm:$0xff] %v1380_v0 }
  0x95   : > { %353 = vst [vmem:[%s1370_s23 + $0x7f0] sm:$0xff] %v1380_v0  ;;  %354 = vst [vmem:[%s1370_s23 + $0x7f8] sm:$0xff] %v1380_v0 }
  0x96   : > { %355 = vst [vmem:[%s1370_s23 + $0x800] sm:$0xff] %v1380_v0  ;;  %356 = vst [vmem:[%s1370_s23 + $0x808] sm:$0xff] %v1380_v0 }
  0x97   : > { %357 = vst [vmem:[%s1370_s23 + $0x810] sm:$0xff] %v1380_v0  ;;  %358 = vst [vmem:[%s1370_s23 + $0x818] sm:$0xff] %v1380_v0 }
  0x98   : > { %359 = vst [vmem:[%s1370_s23 + $0x820] sm:$0xff] %v1380_v0  ;;  %360 = vst [vmem:[%s1370_s23 + $0x828] sm:$0xff] %v1380_v0 }
  0x99   : > { %361 = vst [vmem:[%s1370_s23 + $0x830] sm:$0xff] %v1380_v0  ;;  %362 = vst [vmem:[%s1370_s23 + $0x838] sm:$0xff] %v1380_v0 }
  0x9a   : > { %363 = vst [vmem:[%s1370_s23 + $0x840] sm:$0xff] %v1380_v0  ;;  %364 = vst [vmem:[%s1370_s23 + $0x848] sm:$0xff] %v1380_v0 }
  0x9b   : > { %365 = vst [vmem:[%s1370_s23 + $0x850] sm:$0xff] %v1380_v0  ;;  %366 = vst [vmem:[%s1370_s23 + $0x858] sm:$0xff] %v1380_v0 }
  0x9c   : > { %367 = vst [vmem:[%s1370_s23 + $0x860] sm:$0xff] %v1380_v0  ;;  %368 = vst [vmem:[%s1370_s23 + $0x868] sm:$0xff] %v1380_v0 }
  0x9d   : > { %369 = vst [vmem:[%s1370_s23 + $0x870] sm:$0xff] %v1380_v0  ;;  %370 = vst [vmem:[%s1370_s23 + $0x878] sm:$0xff] %v1380_v0 }
  0x9e   : > { %371 = vst [vmem:[%s1370_s23 + $0x880] sm:$0xff] %v1380_v0  ;;  %372 = vst [vmem:[%s1370_s23 + $0x888] sm:$0xff] %v1380_v0 }
  0x9f   : > { %373 = vst [vmem:[%s1370_s23 + $0x890] sm:$0xff] %v1380_v0  ;;  %374 = vst [vmem:[%s1370_s23 + $0x898] sm:$0xff] %v1380_v0 }
  0xa0   : > { %375 = vst [vmem:[%s1370_s23 + $0x8a0] sm:$0xff] %v1380_v0  ;;  %376 = vst [vmem:[%s1370_s23 + $0x8a8] sm:$0xff] %v1380_v0 }
  0xa1   : > { %377 = vst [vmem:[%s1370_s23 + $0x8b0] sm:$0xff] %v1380_v0  ;;  %378 = vst [vmem:[%s1370_s23 + $0x8b8] sm:$0xff] %v1380_v0 }
  0xa2   : > { %379 = vst [vmem:[%s1370_s23 + $0x8c0] sm:$0xff] %v1380_v0  ;;  %380 = vst [vmem:[%s1370_s23 + $0x8c8] sm:$0xff] %v1380_v0 }
  0xa3   : > { %381 = vst [vmem:[%s1370_s23 + $0x8d0] sm:$0xff] %v1380_v0  ;;  %382 = vst [vmem:[%s1370_s23 + $0x8d8] sm:$0xff] %v1380_v0 }
  0xa4   : > { %383 = vst [vmem:[%s1370_s23 + $0x8e0] sm:$0xff] %v1380_v0  ;;  %384 = vst [vmem:[%s1370_s23 + $0x8e8] sm:$0xff] %v1380_v0 }
  0xa5   : > { %385 = vst [vmem:[%s1370_s23 + $0x8f0] sm:$0xff] %v1380_v0  ;;  %386 = vst [vmem:[%s1370_s23 + $0x8f8] sm:$0xff] %v1380_v0 }
  0xa6   : > { %387 = vst [vmem:[%s1370_s23 + $0x900] sm:$0xff] %v1380_v0  ;;  %388 = vst [vmem:[%s1370_s23 + $0x908] sm:$0xff] %v1380_v0 }
  0xa7   : > { %389 = vst [vmem:[%s1370_s23 + $0x910] sm:$0xff] %v1380_v0  ;;  %390 = vst [vmem:[%s1370_s23 + $0x918] sm:$0xff] %v1380_v0 }
  0xa8   : > { %391 = vst [vmem:[%s1370_s23 + $0x920] sm:$0xff] %v1380_v0  ;;  %392 = vst [vmem:[%s1370_s23 + $0x928] sm:$0xff] %v1380_v0 }
  0xa9   : > { %393 = vst [vmem:[%s1370_s23 + $0x930] sm:$0xff] %v1380_v0  ;;  %394 = vst [vmem:[%s1370_s23 + $0x938] sm:$0xff] %v1380_v0 }
  0xaa   : > { %395 = vst [vmem:[%s1370_s23 + $0x940] sm:$0xff] %v1380_v0  ;;  %396 = vst [vmem:[%s1370_s23 + $0x948] sm:$0xff] %v1380_v0 }
  0xab   : > { %397 = vst [vmem:[%s1370_s23 + $0x950] sm:$0xff] %v1380_v0  ;;  %398 = vst [vmem:[%s1370_s23 + $0x958] sm:$0xff] %v1380_v0 }
  0xac   : > { %399 = vst [vmem:[%s1370_s23 + $0x960] sm:$0xff] %v1380_v0  ;;  %400 = vst [vmem:[%s1370_s23 + $0x968] sm:$0xff] %v1380_v0 }
  0xad   : > { %401 = vst [vmem:[%s1370_s23 + $0x970] sm:$0xff] %v1380_v0  ;;  %402 = vst [vmem:[%s1370_s23 + $0x978] sm:$0xff] %v1380_v0 }
  0xae   : > { %403 = vst [vmem:[%s1370_s23 + $0x980] sm:$0xff] %v1380_v0  ;;  %404 = vst [vmem:[%s1370_s23 + $0x988] sm:$0xff] %v1380_v0 }
  0xaf   : > { %405 = vst [vmem:[%s1370_s23 + $0x990] sm:$0xff] %v1380_v0  ;;  %406 = vst [vmem:[%s1370_s23 + $0x998] sm:$0xff] %v1380_v0 }
  0xb0   : > { %407 = vst [vmem:[%s1370_s23 + $0x9a0] sm:$0xff] %v1380_v0  ;;  %408 = vst [vmem:[%s1370_s23 + $0x9a8] sm:$0xff] %v1380_v0 }
  0xb1   : > { %409 = vst [vmem:[%s1370_s23 + $0x9b0] sm:$0xff] %v1380_v0  ;;  %410 = vst [vmem:[%s1370_s23 + $0x9b8] sm:$0xff] %v1380_v0 }
  0xb2   : > { %411 = vst [vmem:[%s1370_s23 + $0x9c0] sm:$0xff] %v1380_v0  ;;  %412 = vst [vmem:[%s1370_s23 + $0x9c8] sm:$0xff] %v1380_v0 }
  0xb3   : > { %413 = vst [vmem:[%s1370_s23 + $0x9d0] sm:$0xff] %v1380_v0  ;;  %414 = vst [vmem:[%s1370_s23 + $0x9d8] sm:$0xff] %v1380_v0 }
  0xb4   : > { %415 = vst [vmem:[%s1370_s23 + $0x9e0] sm:$0xff] %v1380_v0  ;;  %416 = vst [vmem:[%s1370_s23 + $0x9e8] sm:$0xff] %v1380_v0 }
  0xb5   : > { %417 = vst [vmem:[%s1370_s23 + $0x9f0] sm:$0xff] %v1380_v0  ;;  %418 = vst [vmem:[%s1370_s23 + $0x9f8] sm:$0xff] %v1380_v0 }
  0xb6   : > { %419 = vst [vmem:[%s1370_s23 + $0xa00] sm:$0xff] %v1380_v0  ;;  %420 = vst [vmem:[%s1370_s23 + $0xa08] sm:$0xff] %v1380_v0 }
  0xb7   : > { %421 = vst [vmem:[%s1370_s23 + $0xa10] sm:$0xff] %v1380_v0  ;;  %422 = vst [vmem:[%s1370_s23 + $0xa18] sm:$0xff] %v1380_v0 }
  0xb8   : > { %423 = vst [vmem:[%s1370_s23 + $0xa20] sm:$0xff] %v1380_v0  ;;  %424 = vst [vmem:[%s1370_s23 + $0xa28] sm:$0xff] %v1380_v0 }
  0xb9   : > { %425 = vst [vmem:[%s1370_s23 + $0xa30] sm:$0xff] %v1380_v0  ;;  %426 = vst [vmem:[%s1370_s23 + $0xa38] sm:$0xff] %v1380_v0 }
  0xba   : > { %427 = vst [vmem:[%s1370_s23 + $0xa40] sm:$0xff] %v1380_v0  ;;  %428 = vst [vmem:[%s1370_s23 + $0xa48] sm:$0xff] %v1380_v0 }
  0xbb   : > { %429 = vst [vmem:[%s1370_s23 + $0xa50] sm:$0xff] %v1380_v0  ;;  %430 = vst [vmem:[%s1370_s23 + $0xa58] sm:$0xff] %v1380_v0 }
  0xbc   : > { %431 = vst [vmem:[%s1370_s23 + $0xa60] sm:$0xff] %v1380_v0  ;;  %432 = vst [vmem:[%s1370_s23 + $0xa68] sm:$0xff] %v1380_v0 }
  0xbd   : > { %433 = vst [vmem:[%s1370_s23 + $0xa70] sm:$0xff] %v1380_v0  ;;  %434 = vst [vmem:[%s1370_s23 + $0xa78] sm:$0xff] %v1380_v0 }
  0xbe   : > { %435 = vst [vmem:[%s1370_s23 + $0xa80] sm:$0xff] %v1380_v0  ;;  %436 = vst [vmem:[%s1370_s23 + $0xa88] sm:$0xff] %v1380_v0 }
  0xbf   : > { %437 = vst [vmem:[%s1370_s23 + $0xa90] sm:$0xff] %v1380_v0  ;;  %438 = vst [vmem:[%s1370_s23 + $0xa98] sm:$0xff] %v1380_v0 }
  0xc0   : > { %439 = vst [vmem:[%s1370_s23 + $0xaa0] sm:$0xff] %v1380_v0  ;;  %440 = vst [vmem:[%s1370_s23 + $0xaa8] sm:$0xff] %v1380_v0 }
  0xc1   : > { %441 = vst [vmem:[%s1370_s23 + $0xab0] sm:$0xff] %v1380_v0  ;;  %442 = vst [vmem:[%s1370_s23 + $0xab8] sm:$0xff] %v1380_v0 }
  0xc2   : > { %443 = vst [vmem:[%s1370_s23 + $0xac0] sm:$0xff] %v1380_v0  ;;  %444 = vst [vmem:[%s1370_s23 + $0xac8] sm:$0xff] %v1380_v0 }
  0xc3   : > { %445 = vst [vmem:[%s1370_s23 + $0xad0] sm:$0xff] %v1380_v0  ;;  %446 = vst [vmem:[%s1370_s23 + $0xad8] sm:$0xff] %v1380_v0 }
  0xc4   : > { %447 = vst [vmem:[%s1370_s23 + $0xae0] sm:$0xff] %v1380_v0  ;;  %448 = vst [vmem:[%s1370_s23 + $0xae8] sm:$0xff] %v1380_v0 }
  0xc5   : > { %449 = vst [vmem:[%s1370_s23 + $0xaf0] sm:$0xff] %v1380_v0  ;;  %450 = vst [vmem:[%s1370_s23 + $0xaf8] sm:$0xff] %v1380_v0 }
  0xc6   : > { %451 = vst [vmem:[%s1370_s23 + $0xb00] sm:$0xff] %v1380_v0  ;;  %452 = vst [vmem:[%s1370_s23 + $0xb08] sm:$0xff] %v1380_v0 }
  0xc7   : > { %453 = vst [vmem:[%s1370_s23 + $0xb10] sm:$0xff] %v1380_v0  ;;  %454 = vst [vmem:[%s1370_s23 + $0xb18] sm:$0xff] %v1380_v0 }
  0xc8   : > { %455 = vst [vmem:[%s1370_s23 + $0xb20] sm:$0xff] %v1380_v0  ;;  %456 = vst [vmem:[%s1370_s23 + $0xb28] sm:$0xff] %v1380_v0 }
  0xc9   : > { %457 = vst [vmem:[%s1370_s23 + $0xb30] sm:$0xff] %v1380_v0  ;;  %458 = vst [vmem:[%s1370_s23 + $0xb38] sm:$0xff] %v1380_v0 }
  0xca   : > { %459 = vst [vmem:[%s1370_s23 + $0xb40] sm:$0xff] %v1380_v0  ;;  %460 = vst [vmem:[%s1370_s23 + $0xb48] sm:$0xff] %v1380_v0 }
  0xcb   : > { %461 = vst [vmem:[%s1370_s23 + $0xb50] sm:$0xff] %v1380_v0  ;;  %462 = vst [vmem:[%s1370_s23 + $0xb58] sm:$0xff] %v1380_v0 }
  0xcc   : > { %463 = vst [vmem:[%s1370_s23 + $0xb60] sm:$0xff] %v1380_v0  ;;  %464 = vst [vmem:[%s1370_s23 + $0xb68] sm:$0xff] %v1380_v0 }
  0xcd   : > { %465 = vst [vmem:[%s1370_s23 + $0xb70] sm:$0xff] %v1380_v0  ;;  %466 = vst [vmem:[%s1370_s23 + $0xb78] sm:$0xff] %v1380_v0 }
  0xce   : > { %467 = vst [vmem:[%s1370_s23 + $0xb80] sm:$0xff] %v1380_v0  ;;  %468 = vst [vmem:[%s1370_s23 + $0xb88] sm:$0xff] %v1380_v0 }
  0xcf   : > { %469 = vst [vmem:[%s1370_s23 + $0xb90] sm:$0xff] %v1380_v0  ;;  %470 = vst [vmem:[%s1370_s23 + $0xb98] sm:$0xff] %v1380_v0 }
  0xd0   : > { %471 = vst [vmem:[%s1370_s23 + $0xba0] sm:$0xff] %v1380_v0  ;;  %472 = vst [vmem:[%s1370_s23 + $0xba8] sm:$0xff] %v1380_v0 }
  0xd1   : > { %473 = vst [vmem:[%s1370_s23 + $0xbb0] sm:$0xff] %v1380_v0  ;;  %474 = vst [vmem:[%s1370_s23 + $0xbb8] sm:$0xff] %v1380_v0 }
  0xd2   : > { %475 = vst [vmem:[%s1370_s23 + $0xbc0] sm:$0xff] %v1380_v0  ;;  %476 = vst [vmem:[%s1370_s23 + $0xbc8] sm:$0xff] %v1380_v0 }
  0xd3   : > { %477 = vst [vmem:[%s1370_s23 + $0xbd0] sm:$0xff] %v1380_v0  ;;  %478 = vst [vmem:[%s1370_s23 + $0xbd8] sm:$0xff] %v1380_v0 }
  0xd4   : > { %479 = vst [vmem:[%s1370_s23 + $0xbe0] sm:$0xff] %v1380_v0  ;;  %480 = vst [vmem:[%s1370_s23 + $0xbe8] sm:$0xff] %v1380_v0 }
  0xd5   : > { %481 = vst [vmem:[%s1370_s23 + $0xbf0] sm:$0xff] %v1380_v0  ;;  %482 = vst [vmem:[%s1370_s23 + $0xbf8] sm:$0xff] %v1380_v0 }
  0xd6   : > { %483 = vst [vmem:[%s1370_s23 + $0xc00] sm:$0xff] %v1380_v0  ;;  %484 = vst [vmem:[%s1370_s23 + $0xc08] sm:$0xff] %v1380_v0 }
  0xd7   : > { %485 = vst [vmem:[%s1370_s23 + $0xc10] sm:$0xff] %v1380_v0  ;;  %486 = vst [vmem:[%s1370_s23 + $0xc18] sm:$0xff] %v1380_v0 }
  0xd8   : > { %487 = vst [vmem:[%s1370_s23 + $0xc20] sm:$0xff] %v1380_v0  ;;  %488 = vst [vmem:[%s1370_s23 + $0xc28] sm:$0xff] %v1380_v0 }
  0xd9   : > { %489 = vst [vmem:[%s1370_s23 + $0xc30] sm:$0xff] %v1380_v0  ;;  %490 = vst [vmem:[%s1370_s23 + $0xc38] sm:$0xff] %v1380_v0 }
  0xda   : > { %491 = vst [vmem:[%s1370_s23 + $0xc40] sm:$0xff] %v1380_v0  ;;  %492 = vst [vmem:[%s1370_s23 + $0xc48] sm:$0xff] %v1380_v0 }
  0xdb   : > { %493 = vst [vmem:[%s1370_s23 + $0xc50] sm:$0xff] %v1380_v0  ;;  %494 = vst [vmem:[%s1370_s23 + $0xc58] sm:$0xff] %v1380_v0 }
  0xdc   : > { %495 = vst [vmem:[%s1370_s23 + $0xc60] sm:$0xff] %v1380_v0  ;;  %496 = vst [vmem:[%s1370_s23 + $0xc68] sm:$0xff] %v1380_v0 }
  0xdd   : > { %497 = vst [vmem:[%s1370_s23 + $0xc70] sm:$0xff] %v1380_v0  ;;  %498 = vst [vmem:[%s1370_s23 + $0xc78] sm:$0xff] %v1380_v0 }
  0xde   : > { %499 = vst [vmem:[%s1370_s23 + $0xc80] sm:$0xff] %v1380_v0  ;;  %500 = vst [vmem:[%s1370_s23 + $0xc88] sm:$0xff] %v1380_v0 }
  0xdf   : > { %501 = vst [vmem:[%s1370_s23 + $0xc90] sm:$0xff] %v1380_v0  ;;  %502 = vst [vmem:[%s1370_s23 + $0xc98] sm:$0xff] %v1380_v0 }
  0xe0   : > { %503 = vst [vmem:[%s1370_s23 + $0xca0] sm:$0xff] %v1380_v0  ;;  %504 = vst [vmem:[%s1370_s23 + $0xca8] sm:$0xff] %v1380_v0 }
  0xe1   : > { %505 = vst [vmem:[%s1370_s23 + $0xcb0] sm:$0xff] %v1380_v0  ;;  %506 = vst [vmem:[%s1370_s23 + $0xcb8] sm:$0xff] %v1380_v0 }
  0xe2   : > { %507 = vst [vmem:[%s1370_s23 + $0xcc0] sm:$0xff] %v1380_v0  ;;  %508 = vst [vmem:[%s1370_s23 + $0xcc8] sm:$0xff] %v1380_v0 }
  0xe3   : > { %509 = vst [vmem:[%s1370_s23 + $0xcd0] sm:$0xff] %v1380_v0  ;;  %510 = vst [vmem:[%s1370_s23 + $0xcd8] sm:$0xff] %v1380_v0 }
  0xe4   : > { %511 = vst [vmem:[%s1370_s23 + $0xce0] sm:$0xff] %v1380_v0  ;;  %512 = vst [vmem:[%s1370_s23 + $0xce8] sm:$0xff] %v1380_v0 }
  0xe5   : > { %513 = vst [vmem:[%s1370_s23 + $0xcf0] sm:$0xff] %v1380_v0  ;;  %514 = vst [vmem:[%s1370_s23 + $0xcf8] sm:$0xff] %v1380_v0 }
  0xe6   : > { %515 = vst [vmem:[%s1370_s23 + $0xd00] sm:$0xff] %v1380_v0  ;;  %516 = vst [vmem:[%s1370_s23 + $0xd08] sm:$0xff] %v1380_v0 }
  0xe7   : > { %517 = vst [vmem:[%s1370_s23 + $0xd10] sm:$0xff] %v1380_v0  ;;  %518 = vst [vmem:[%s1370_s23 + $0xd18] sm:$0xff] %v1380_v0 }
  0xe8   : > { %519 = vst [vmem:[%s1370_s23 + $0xd20] sm:$0xff] %v1380_v0  ;;  %520 = vst [vmem:[%s1370_s23 + $0xd28] sm:$0xff] %v1380_v0 }
  0xe9   : > { %521 = vst [vmem:[%s1370_s23 + $0xd30] sm:$0xff] %v1380_v0  ;;  %522 = vst [vmem:[%s1370_s23 + $0xd38] sm:$0xff] %v1380_v0 }
  0xea   : > { %523 = vst [vmem:[%s1370_s23 + $0xd40] sm:$0xff] %v1380_v0  ;;  %524 = vst [vmem:[%s1370_s23 + $0xd48] sm:$0xff] %v1380_v0 }
  0xeb   : > { %525 = vst [vmem:[%s1370_s23 + $0xd50] sm:$0xff] %v1380_v0  ;;  %526 = vst [vmem:[%s1370_s23 + $0xd58] sm:$0xff] %v1380_v0 }
  0xec   : > { %527 = vst [vmem:[%s1370_s23 + $0xd60] sm:$0xff] %v1380_v0  ;;  %528 = vst [vmem:[%s1370_s23 + $0xd68] sm:$0xff] %v1380_v0 }
  0xed   : > { %529 = vst [vmem:[%s1370_s23 + $0xd70] sm:$0xff] %v1380_v0  ;;  %530 = vst [vmem:[%s1370_s23 + $0xd78] sm:$0xff] %v1380_v0 }
  0xee   : > { %531 = vst [vmem:[%s1370_s23 + $0xd80] sm:$0xff] %v1380_v0  ;;  %532 = vst [vmem:[%s1370_s23 + $0xd88] sm:$0xff] %v1380_v0 }
  0xef   : > { %533 = vst [vmem:[%s1370_s23 + $0xd90] sm:$0xff] %v1380_v0  ;;  %534 = vst [vmem:[%s1370_s23 + $0xd98] sm:$0xff] %v1380_v0 }
  0xf0   : > { %535 = vst [vmem:[%s1370_s23 + $0xda0] sm:$0xff] %v1380_v0  ;;  %536 = vst [vmem:[%s1370_s23 + $0xda8] sm:$0xff] %v1380_v0 }
  0xf1   : > { %537 = vst [vmem:[%s1370_s23 + $0xdb0] sm:$0xff] %v1380_v0  ;;  %538 = vst [vmem:[%s1370_s23 + $0xdb8] sm:$0xff] %v1380_v0 }
  0xf2   : > { %539 = vst [vmem:[%s1370_s23 + $0xdc0] sm:$0xff] %v1380_v0  ;;  %540 = vst [vmem:[%s1370_s23 + $0xdc8] sm:$0xff] %v1380_v0 }
  0xf3   : > { %541 = vst [vmem:[%s1370_s23 + $0xdd0] sm:$0xff] %v1380_v0  ;;  %542 = vst [vmem:[%s1370_s23 + $0xdd8] sm:$0xff] %v1380_v0 }
  0xf4   : > { %543 = vst [vmem:[%s1370_s23 + $0xde0] sm:$0xff] %v1380_v0  ;;  %544 = vst [vmem:[%s1370_s23 + $0xde8] sm:$0xff] %v1380_v0 }
  0xf5   : > { %545 = vst [vmem:[%s1370_s23 + $0xdf0] sm:$0xff] %v1380_v0  ;;  %546 = vst [vmem:[%s1370_s23 + $0xdf8] sm:$0xff] %v1380_v0 }
  0xf6   : > { %547 = vst [vmem:[%s1370_s23 + $0xe00] sm:$0xff] %v1380_v0  ;;  %548 = vst [vmem:[%s1370_s23 + $0xe08] sm:$0xff] %v1380_v0 }
  0xf7   : > { %549 = vst [vmem:[%s1370_s23 + $0xe10] sm:$0xff] %v1380_v0  ;;  %550 = vst [vmem:[%s1370_s23 + $0xe18] sm:$0xff] %v1380_v0 }
  0xf8   : > { %551 = vst [vmem:[%s1370_s23 + $0xe20] sm:$0xff] %v1380_v0  ;;  %552 = vst [vmem:[%s1370_s23 + $0xe28] sm:$0xff] %v1380_v0 }
  0xf9   : > { %553 = vst [vmem:[%s1370_s23 + $0xe30] sm:$0xff] %v1380_v0  ;;  %554 = vst [vmem:[%s1370_s23 + $0xe38] sm:$0xff] %v1380_v0 }
  0xfa   : > { %555 = vst [vmem:[%s1370_s23 + $0xe40] sm:$0xff] %v1380_v0  ;;  %556 = vst [vmem:[%s1370_s23 + $0xe48] sm:$0xff] %v1380_v0 }
  0xfb   : > { %557 = vst [vmem:[%s1370_s23 + $0xe50] sm:$0xff] %v1380_v0  ;;  %558 = vst [vmem:[%s1370_s23 + $0xe58] sm:$0xff] %v1380_v0 }
  0xfc   : > { %559 = vst [vmem:[%s1370_s23 + $0xe60] sm:$0xff] %v1380_v0  ;;  %560 = vst [vmem:[%s1370_s23 + $0xe68] sm:$0xff] %v1380_v0 }
  0xfd   : > { %561 = vst [vmem:[%s1370_s23 + $0xe70] sm:$0xff] %v1380_v0  ;;  %562 = vst [vmem:[%s1370_s23 + $0xe78] sm:$0xff] %v1380_v0 }
  0xfe   : > { %563 = vst [vmem:[%s1370_s23 + $0xe80] sm:$0xff] %v1380_v0  ;;  %564 = vst [vmem:[%s1370_s23 + $0xe88] sm:$0xff] %v1380_v0 }
  0xff   : > { %565 = vst [vmem:[%s1370_s23 + $0xe90] sm:$0xff] %v1380_v0  ;;  %566 = vst [vmem:[%s1370_s23 + $0xe98] sm:$0xff] %v1380_v0 }
 0x100   : > { %567 = vst [vmem:[%s1370_s23 + $0xea0] sm:$0xff] %v1380_v0  ;;  %568 = vst [vmem:[%s1370_s23 + $0xea8] sm:$0xff] %v1380_v0 }
 0x101   : > { %569 = vst [vmem:[%s1370_s23 + $0xeb0] sm:$0xff] %v1380_v0  ;;  %570 = vst [vmem:[%s1370_s23 + $0xeb8] sm:$0xff] %v1380_v0 }
 0x102   : > { %571 = vst [vmem:[%s1370_s23 + $0xec0] sm:$0xff] %v1380_v0  ;;  %572 = vst [vmem:[%s1370_s23 + $0xec8] sm:$0xff] %v1380_v0 }
 0x103   : > { %573 = vst [vmem:[%s1370_s23 + $0xed0] sm:$0xff] %v1380_v0  ;;  %574 = vst [vmem:[%s1370_s23 + $0xed8] sm:$0xff] %v1380_v0 }
 0x104   : > { %575 = vst [vmem:[%s1370_s23 + $0xee0] sm:$0xff] %v1380_v0  ;;  %576 = vst [vmem:[%s1370_s23 + $0xee8] sm:$0xff] %v1380_v0 }
 0x105   : > { %577 = vst [vmem:[%s1370_s23 + $0xef0] sm:$0xff] %v1380_v0  ;;  %578 = vst [vmem:[%s1370_s23 + $0xef8] sm:$0xff] %v1380_v0 }
 0x106   : > { %579 = vst [vmem:[%s1370_s23 + $0xf00] sm:$0xff] %v1380_v0  ;;  %580 = vst [vmem:[%s1370_s23 + $0xf08] sm:$0xff] %v1380_v0 }
 0x107   : > { %581 = vst [vmem:[%s1370_s23 + $0xf10] sm:$0xff] %v1380_v0  ;;  %582 = vst [vmem:[%s1370_s23 + $0xf18] sm:$0xff] %v1380_v0 }
 0x108   : > { %583 = vst [vmem:[%s1370_s23 + $0xf20] sm:$0xff] %v1380_v0  ;;  %584 = vst [vmem:[%s1370_s23 + $0xf28] sm:$0xff] %v1380_v0 }
 0x109   : > { %585 = vst [vmem:[%s1370_s23 + $0xf30] sm:$0xff] %v1380_v0  ;;  %586 = vst [vmem:[%s1370_s23 + $0xf38] sm:$0xff] %v1380_v0 }
 0x10a   : > { %587 = vst [vmem:[%s1370_s23 + $0xf40] sm:$0xff] %v1380_v0  ;;  %588 = vst [vmem:[%s1370_s23 + $0xf48] sm:$0xff] %v1380_v0 }
 0x10b   : > { %589 = vst [vmem:[%s1370_s23 + $0xf50] sm:$0xff] %v1380_v0  ;;  %590 = vst [vmem:[%s1370_s23 + $0xf58] sm:$0xff] %v1380_v0 }
 0x10c   : > { %591 = vst [vmem:[%s1370_s23 + $0xf60] sm:$0xff] %v1380_v0  ;;  %592 = vst [vmem:[%s1370_s23 + $0xf68] sm:$0xff] %v1380_v0 }
 0x10d   : > { %593 = vst [vmem:[%s1370_s23 + $0xf70] sm:$0xff] %v1380_v0  ;;  %594 = vst [vmem:[%s1370_s23 + $0xf78] sm:$0xff] %v1380_v0 }
 0x10e   : > { %595 = vst [vmem:[%s1370_s23 + $0xf80] sm:$0xff] %v1380_v0  ;;  %596 = vst [vmem:[%s1370_s23 + $0xf88] sm:$0xff] %v1380_v0 }
 0x10f   : > { %597 = vst [vmem:[%s1370_s23 + $0xf90] sm:$0xff] %v1380_v0  ;;  %598 = vst [vmem:[%s1370_s23 + $0xf98] sm:$0xff] %v1380_v0 }
 0x110   : > { %599 = vst [vmem:[%s1370_s23 + $0xfa0] sm:$0xff] %v1380_v0  ;;  %600 = vst [vmem:[%s1370_s23 + $0xfa8] sm:$0xff] %v1380_v0 }
 0x111   : > { %601 = vst [vmem:[%s1370_s23 + $0xfb0] sm:$0xff] %v1380_v0  ;;  %602 = vst [vmem:[%s1370_s23 + $0xfb8] sm:$0xff] %v1380_v0 }
 0x112   : > { %603 = vst [vmem:[%s1370_s23 + $0xfc0] sm:$0xff] %v1380_v0  ;;  %604 = vst [vmem:[%s1370_s23 + $0xfc8] sm:$0xff] %v1380_v0 }
 0x113   : > { %605 = vst [vmem:[%s1370_s23 + $0xfd0] sm:$0xff] %v1380_v0  ;;  %606 = vst [vmem:[%s1370_s23 + $0xfd8] sm:$0xff] %v1380_v0 }
 0x114   : > { %607 = vst [vmem:[%s1370_s23 + $0xfe0] sm:$0xff] %v1380_v0  ;;  %608 = vst [vmem:[%s1370_s23 + $0xfe8] sm:$0xff] %v1380_v0 }
 0x115   : > { %609 = vst [vmem:[%s1370_s23 + $0xff0] sm:$0xff] %v1380_v0  ;;  %610 = vst [vmem:[%s1370_s23 + $0xff8] sm:$0xff] %v1380_v0 }
 0x116   : > { %611 = vst [vmem:[%s1370_s23 + $0x1000] sm:$0xff] %v2407_v1  ;;  %612 = vst [vmem:[%s1370_s23 + $0x1008] sm:$0xff] %v2407_v1 }
 0x117   : > { %613 = vst [vmem:[%s1370_s23 + $0x1010] sm:$0xff] %v2407_v1  ;;  %614 = vst [vmem:[%s1370_s23 + $0x1018] sm:$0xff] %v2407_v1 }
 0x118   : > { %615 = vst [vmem:[%s1370_s23 + $0x1020] sm:$0xff] %v2407_v1  ;;  %616 = vst [vmem:[%s1370_s23 + $0x1028] sm:$0xff] %v2407_v1 }
 0x119   : > { %617 = vst [vmem:[%s1370_s23 + $0x1030] sm:$0xff] %v2407_v1  ;;  %618 = vst [vmem:[%s1370_s23 + $0x1038] sm:$0xff] %v2407_v1 }
 0x11a   : > { %619 = vst [vmem:[%s1370_s23 + $0x1040] sm:$0xff] %v2407_v1  ;;  %620 = vst [vmem:[%s1370_s23 + $0x1048] sm:$0xff] %v2407_v1 }
 0x11b   : > { %621 = vst [vmem:[%s1370_s23 + $0x1050] sm:$0xff] %v2407_v1  ;;  %622 = vst [vmem:[%s1370_s23 + $0x1058] sm:$0xff] %v2407_v1 }
 0x11c   : > { %623 = vst [vmem:[%s1370_s23 + $0x1060] sm:$0xff] %v2407_v1  ;;  %624 = vst [vmem:[%s1370_s23 + $0x1068] sm:$0xff] %v2407_v1 }
 0x11d   : > { %625 = vst [vmem:[%s1370_s23 + $0x1070] sm:$0xff] %v2407_v1  ;;  %626 = vst [vmem:[%s1370_s23 + $0x1078] sm:$0xff] %v2407_v1 }
 0x11e   : > { %627 = vst [vmem:[%s1370_s23 + $0x1080] sm:$0xff] %v2407_v1  ;;  %628 = vst [vmem:[%s1370_s23 + $0x1088] sm:$0xff] %v2407_v1 }
 0x11f   : > { %629 = vst [vmem:[%s1370_s23 + $0x1090] sm:$0xff] %v2407_v1  ;;  %630 = vst [vmem:[%s1370_s23 + $0x1098] sm:$0xff] %v2407_v1 }
 0x120   : > { %631 = vst [vmem:[%s1370_s23 + $0x10a0] sm:$0xff] %v2407_v1  ;;  %632 = vst [vmem:[%s1370_s23 + $0x10a8] sm:$0xff] %v2407_v1 }
 0x121   : > { %633 = vst [vmem:[%s1370_s23 + $0x10b0] sm:$0xff] %v2407_v1  ;;  %634 = vst [vmem:[%s1370_s23 + $0x10b8] sm:$0xff] %v2407_v1 }
 0x122   : > { %635 = vst [vmem:[%s1370_s23 + $0x10c0] sm:$0xff] %v2407_v1  ;;  %636 = vst [vmem:[%s1370_s23 + $0x10c8] sm:$0xff] %v2407_v1 }
 0x123   : > { %637 = vst [vmem:[%s1370_s23 + $0x10d0] sm:$0xff] %v2407_v1  ;;  %638 = vst [vmem:[%s1370_s23 + $0x10d8] sm:$0xff] %v2407_v1 }
 0x124   : > { %639 = vst [vmem:[%s1370_s23 + $0x10e0] sm:$0xff] %v2407_v1  ;;  %640 = vst [vmem:[%s1370_s23 + $0x10e8] sm:$0xff] %v2407_v1 }
 0x125   : > { %641 = vst [vmem:[%s1370_s23 + $0x10f0] sm:$0xff] %v2407_v1  ;;  %642 = vst [vmem:[%s1370_s23 + $0x10f8] sm:$0xff] %v2407_v1 }
 0x126   : > { %643 = vst [vmem:[%s1370_s23 + $0x1100] sm:$0xff] %v2407_v1  ;;  %644 = vst [vmem:[%s1370_s23 + $0x1108] sm:$0xff] %v2407_v1 }
 0x127   : > { %645 = vst [vmem:[%s1370_s23 + $0x1110] sm:$0xff] %v2407_v1  ;;  %646 = vst [vmem:[%s1370_s23 + $0x1118] sm:$0xff] %v2407_v1 }
 0x128   : > { %647 = vst [vmem:[%s1370_s23 + $0x1120] sm:$0xff] %v2407_v1  ;;  %648 = vst [vmem:[%s1370_s23 + $0x1128] sm:$0xff] %v2407_v1 }
 0x129   : > { %649 = vst [vmem:[%s1370_s23 + $0x1130] sm:$0xff] %v2407_v1  ;;  %650 = vst [vmem:[%s1370_s23 + $0x1138] sm:$0xff] %v2407_v1 }
 0x12a   : > { %651 = vst [vmem:[%s1370_s23 + $0x1140] sm:$0xff] %v2407_v1  ;;  %652 = vst [vmem:[%s1370_s23 + $0x1148] sm:$0xff] %v2407_v1 }
 0x12b   : > { %653 = vst [vmem:[%s1370_s23 + $0x1150] sm:$0xff] %v2407_v1  ;;  %654 = vst [vmem:[%s1370_s23 + $0x1158] sm:$0xff] %v2407_v1 }
 0x12c   : > { %655 = vst [vmem:[%s1370_s23 + $0x1160] sm:$0xff] %v2407_v1  ;;  %656 = vst [vmem:[%s1370_s23 + $0x1168] sm:$0xff] %v2407_v1 }
 0x12d   : > { %657 = vst [vmem:[%s1370_s23 + $0x1170] sm:$0xff] %v2407_v1  ;;  %658 = vst [vmem:[%s1370_s23 + $0x1178] sm:$0xff] %v2407_v1 }
 0x12e   : > { %659 = vst [vmem:[%s1370_s23 + $0x1180] sm:$0xff] %v2407_v1  ;;  %660 = vst [vmem:[%s1370_s23 + $0x1188] sm:$0xff] %v2407_v1 }
 0x12f   : > { %661 = vst [vmem:[%s1370_s23 + $0x1190] sm:$0xff] %v2407_v1  ;;  %662 = vst [vmem:[%s1370_s23 + $0x1198] sm:$0xff] %v2407_v1 }
 0x130   : > { %663 = vst [vmem:[%s1370_s23 + $0x11a0] sm:$0xff] %v2407_v1  ;;  %664 = vst [vmem:[%s1370_s23 + $0x11a8] sm:$0xff] %v2407_v1 }
 0x131   : > { %665 = vst [vmem:[%s1370_s23 + $0x11b0] sm:$0xff] %v2407_v1  ;;  %666 = vst [vmem:[%s1370_s23 + $0x11b8] sm:$0xff] %v2407_v1 }
 0x132   : > { %667 = vst [vmem:[%s1370_s23 + $0x11c0] sm:$0xff] %v2407_v1  ;;  %668 = vst [vmem:[%s1370_s23 + $0x11c8] sm:$0xff] %v2407_v1 }
 0x133   : > { %669 = vst [vmem:[%s1370_s23 + $0x11d0] sm:$0xff] %v2407_v1  ;;  %670 = vst [vmem:[%s1370_s23 + $0x11d8] sm:$0xff] %v2407_v1 }
 0x134   : > { %671 = vst [vmem:[%s1370_s23 + $0x11e0] sm:$0xff] %v2407_v1  ;;  %672 = vst [vmem:[%s1370_s23 + $0x11e8] sm:$0xff] %v2407_v1 }
 0x135   : > { %673 = vst [vmem:[%s1370_s23 + $0x11f0] sm:$0xff] %v2407_v1  ;;  %674 = vst [vmem:[%s1370_s23 + $0x11f8] sm:$0xff] %v2407_v1 }
 0x136   : > { %675 = vst [vmem:[%s1370_s23 + $0x1200] sm:$0xff] %v2407_v1  ;;  %676 = vst [vmem:[%s1370_s23 + $0x1208] sm:$0xff] %v2407_v1 }
 0x137   : > { %677 = vst [vmem:[%s1370_s23 + $0x1210] sm:$0xff] %v2407_v1  ;;  %678 = vst [vmem:[%s1370_s23 + $0x1218] sm:$0xff] %v2407_v1 }
 0x138   : > { %679 = vst [vmem:[%s1370_s23 + $0x1220] sm:$0xff] %v2407_v1  ;;  %680 = vst [vmem:[%s1370_s23 + $0x1228] sm:$0xff] %v2407_v1 }
 0x139   : > { %681 = vst [vmem:[%s1370_s23 + $0x1230] sm:$0xff] %v2407_v1  ;;  %682 = vst [vmem:[%s1370_s23 + $0x1238] sm:$0xff] %v2407_v1 }
 0x13a   : > { %683 = vst [vmem:[%s1370_s23 + $0x1240] sm:$0xff] %v2407_v1  ;;  %684 = vst [vmem:[%s1370_s23 + $0x1248] sm:$0xff] %v2407_v1 }
 0x13b   : > { %685 = vst [vmem:[%s1370_s23 + $0x1250] sm:$0xff] %v2407_v1  ;;  %686 = vst [vmem:[%s1370_s23 + $0x1258] sm:$0xff] %v2407_v1 }
 0x13c   : > { %687 = vst [vmem:[%s1370_s23 + $0x1260] sm:$0xff] %v2407_v1  ;;  %688 = vst [vmem:[%s1370_s23 + $0x1268] sm:$0xff] %v2407_v1 }
 0x13d   : > { %689 = vst [vmem:[%s1370_s23 + $0x1270] sm:$0xff] %v2407_v1  ;;  %690 = vst [vmem:[%s1370_s23 + $0x1278] sm:$0xff] %v2407_v1 }
 0x13e   : > { %691 = vst [vmem:[%s1370_s23 + $0x1280] sm:$0xff] %v2407_v1  ;;  %692 = vst [vmem:[%s1370_s23 + $0x1288] sm:$0xff] %v2407_v1 }
 0x13f   : > { %693 = vst [vmem:[%s1370_s23 + $0x1290] sm:$0xff] %v2407_v1  ;;  %694 = vst [vmem:[%s1370_s23 + $0x1298] sm:$0xff] %v2407_v1 }
 0x140   : > { %695 = vst [vmem:[%s1370_s23 + $0x12a0] sm:$0xff] %v2407_v1  ;;  %696 = vst [vmem:[%s1370_s23 + $0x12a8] sm:$0xff] %v2407_v1 }
 0x141   : > { %697 = vst [vmem:[%s1370_s23 + $0x12b0] sm:$0xff] %v2407_v1  ;;  %698 = vst [vmem:[%s1370_s23 + $0x12b8] sm:$0xff] %v2407_v1 }
 0x142   : > { %699 = vst [vmem:[%s1370_s23 + $0x12c0] sm:$0xff] %v2407_v1  ;;  %700 = vst [vmem:[%s1370_s23 + $0x12c8] sm:$0xff] %v2407_v1 }
 0x143   : > { %701 = vst [vmem:[%s1370_s23 + $0x12d0] sm:$0xff] %v2407_v1  ;;  %702 = vst [vmem:[%s1370_s23 + $0x12d8] sm:$0xff] %v2407_v1 }
 0x144   : > { %703 = vst [vmem:[%s1370_s23 + $0x12e0] sm:$0xff] %v2407_v1  ;;  %704 = vst [vmem:[%s1370_s23 + $0x12e8] sm:$0xff] %v2407_v1 }
 0x145   : > { %705 = vst [vmem:[%s1370_s23 + $0x12f0] sm:$0xff] %v2407_v1  ;;  %706 = vst [vmem:[%s1370_s23 + $0x12f8] sm:$0xff] %v2407_v1 }
 0x146   : > { %707 = vst [vmem:[%s1370_s23 + $0x1300] sm:$0xff] %v2407_v1  ;;  %708 = vst [vmem:[%s1370_s23 + $0x1308] sm:$0xff] %v2407_v1 }
 0x147   : > { %709 = vst [vmem:[%s1370_s23 + $0x1310] sm:$0xff] %v2407_v1  ;;  %710 = vst [vmem:[%s1370_s23 + $0x1318] sm:$0xff] %v2407_v1 }
 0x148   : > { %711 = vst [vmem:[%s1370_s23 + $0x1320] sm:$0xff] %v2407_v1  ;;  %712 = vst [vmem:[%s1370_s23 + $0x1328] sm:$0xff] %v2407_v1 }
 0x149   : > { %713 = vst [vmem:[%s1370_s23 + $0x1330] sm:$0xff] %v2407_v1  ;;  %714 = vst [vmem:[%s1370_s23 + $0x1338] sm:$0xff] %v2407_v1 }
 0x14a   : > { %715 = vst [vmem:[%s1370_s23 + $0x1340] sm:$0xff] %v2407_v1  ;;  %716 = vst [vmem:[%s1370_s23 + $0x1348] sm:$0xff] %v2407_v1 }
 0x14b   : > { %717 = vst [vmem:[%s1370_s23 + $0x1350] sm:$0xff] %v2407_v1  ;;  %718 = vst [vmem:[%s1370_s23 + $0x1358] sm:$0xff] %v2407_v1 }
 0x14c   : > { %719 = vst [vmem:[%s1370_s23 + $0x1360] sm:$0xff] %v2407_v1  ;;  %720 = vst [vmem:[%s1370_s23 + $0x1368] sm:$0xff] %v2407_v1 }
 0x14d   : > { %721 = vst [vmem:[%s1370_s23 + $0x1370] sm:$0xff] %v2407_v1  ;;  %722 = vst [vmem:[%s1370_s23 + $0x1378] sm:$0xff] %v2407_v1 }
 0x14e   : > { %723 = vst [vmem:[%s1370_s23 + $0x1380] sm:$0xff] %v2407_v1  ;;  %724 = vst [vmem:[%s1370_s23 + $0x1388] sm:$0xff] %v2407_v1 }
 0x14f   : > { %725 = vst [vmem:[%s1370_s23 + $0x1390] sm:$0xff] %v2407_v1  ;;  %726 = vst [vmem:[%s1370_s23 + $0x1398] sm:$0xff] %v2407_v1 }
 0x150   : > { %727 = vst [vmem:[%s1370_s23 + $0x13a0] sm:$0xff] %v2407_v1  ;;  %728 = vst [vmem:[%s1370_s23 + $0x13a8] sm:$0xff] %v2407_v1 }
 0x151   : > { %729 = vst [vmem:[%s1370_s23 + $0x13b0] sm:$0xff] %v2407_v1  ;;  %730 = vst [vmem:[%s1370_s23 + $0x13b8] sm:$0xff] %v2407_v1 }
 0x152   : > { %731 = vst [vmem:[%s1370_s23 + $0x13c0] sm:$0xff] %v2407_v1  ;;  %732 = vst [vmem:[%s1370_s23 + $0x13c8] sm:$0xff] %v2407_v1 }
 0x153   : > { %733 = vst [vmem:[%s1370_s23 + $0x13d0] sm:$0xff] %v2407_v1  ;;  %734 = vst [vmem:[%s1370_s23 + $0x13d8] sm:$0xff] %v2407_v1 }
 0x154   : > { %735 = vst [vmem:[%s1370_s23 + $0x13e0] sm:$0xff] %v2407_v1  ;;  %736 = vst [vmem:[%s1370_s23 + $0x13e8] sm:$0xff] %v2407_v1 }
 0x155   : > { %737 = vst [vmem:[%s1370_s23 + $0x13f0] sm:$0xff] %v2407_v1  ;;  %738 = vst [vmem:[%s1370_s23 + $0x13f8] sm:$0xff] %v2407_v1 }
 0x156   : > { %739 = vst [vmem:[%s1370_s23 + $0x1400] sm:$0xff] %v2407_v1  ;;  %740 = vst [vmem:[%s1370_s23 + $0x1408] sm:$0xff] %v2407_v1 }
 0x157   : > { %741 = vst [vmem:[%s1370_s23 + $0x1410] sm:$0xff] %v2407_v1  ;;  %742 = vst [vmem:[%s1370_s23 + $0x1418] sm:$0xff] %v2407_v1 }
 0x158   : > { %743 = vst [vmem:[%s1370_s23 + $0x1420] sm:$0xff] %v2407_v1  ;;  %744 = vst [vmem:[%s1370_s23 + $0x1428] sm:$0xff] %v2407_v1 }
 0x159   : > { %745 = vst [vmem:[%s1370_s23 + $0x1430] sm:$0xff] %v2407_v1  ;;  %746 = vst [vmem:[%s1370_s23 + $0x1438] sm:$0xff] %v2407_v1 }
 0x15a   : > { %747 = vst [vmem:[%s1370_s23 + $0x1440] sm:$0xff] %v2407_v1  ;;  %748 = vst [vmem:[%s1370_s23 + $0x1448] sm:$0xff] %v2407_v1 }
 0x15b   : > { %749 = vst [vmem:[%s1370_s23 + $0x1450] sm:$0xff] %v2407_v1  ;;  %750 = vst [vmem:[%s1370_s23 + $0x1458] sm:$0xff] %v2407_v1 }
 0x15c   : > { %751 = vst [vmem:[%s1370_s23 + $0x1460] sm:$0xff] %v2407_v1  ;;  %752 = vst [vmem:[%s1370_s23 + $0x1468] sm:$0xff] %v2407_v1 }
 0x15d   : > { %753 = vst [vmem:[%s1370_s23 + $0x1470] sm:$0xff] %v2407_v1  ;;  %754 = vst [vmem:[%s1370_s23 + $0x1478] sm:$0xff] %v2407_v1 }
 0x15e   : > { %755 = vst [vmem:[%s1370_s23 + $0x1480] sm:$0xff] %v2407_v1  ;;  %756 = vst [vmem:[%s1370_s23 + $0x1488] sm:$0xff] %v2407_v1 }
 0x15f   : > { %757 = vst [vmem:[%s1370_s23 + $0x1490] sm:$0xff] %v2407_v1  ;;  %758 = vst [vmem:[%s1370_s23 + $0x1498] sm:$0xff] %v2407_v1 }
 0x160   : > { %759 = vst [vmem:[%s1370_s23 + $0x14a0] sm:$0xff] %v2407_v1  ;;  %760 = vst [vmem:[%s1370_s23 + $0x14a8] sm:$0xff] %v2407_v1 }
 0x161   : > { %761 = vst [vmem:[%s1370_s23 + $0x14b0] sm:$0xff] %v2407_v1  ;;  %762 = vst [vmem:[%s1370_s23 + $0x14b8] sm:$0xff] %v2407_v1 }
 0x162   : > { %763 = vst [vmem:[%s1370_s23 + $0x14c0] sm:$0xff] %v2407_v1  ;;  %764 = vst [vmem:[%s1370_s23 + $0x14c8] sm:$0xff] %v2407_v1 }
 0x163   : > { %765 = vst [vmem:[%s1370_s23 + $0x14d0] sm:$0xff] %v2407_v1  ;;  %766 = vst [vmem:[%s1370_s23 + $0x14d8] sm:$0xff] %v2407_v1 }
 0x164   : > { %767 = vst [vmem:[%s1370_s23 + $0x14e0] sm:$0xff] %v2407_v1  ;;  %768 = vst [vmem:[%s1370_s23 + $0x14e8] sm:$0xff] %v2407_v1 }
 0x165   : > { %769 = vst [vmem:[%s1370_s23 + $0x14f0] sm:$0xff] %v2407_v1  ;;  %770 = vst [vmem:[%s1370_s23 + $0x14f8] sm:$0xff] %v2407_v1 }
 0x166   : > { %771 = vst [vmem:[%s1370_s23 + $0x1500] sm:$0xff] %v2407_v1  ;;  %772 = vst [vmem:[%s1370_s23 + $0x1508] sm:$0xff] %v2407_v1 }
 0x167   : > { %773 = vst [vmem:[%s1370_s23 + $0x1510] sm:$0xff] %v2407_v1  ;;  %774 = vst [vmem:[%s1370_s23 + $0x1518] sm:$0xff] %v2407_v1 }
 0x168   : > { %775 = vst [vmem:[%s1370_s23 + $0x1520] sm:$0xff] %v2407_v1  ;;  %776 = vst [vmem:[%s1370_s23 + $0x1528] sm:$0xff] %v2407_v1 }
 0x169   : > { %777 = vst [vmem:[%s1370_s23 + $0x1530] sm:$0xff] %v2407_v1  ;;  %778 = vst [vmem:[%s1370_s23 + $0x1538] sm:$0xff] %v2407_v1 }
 0x16a   : > { %779 = vst [vmem:[%s1370_s23 + $0x1540] sm:$0xff] %v2407_v1  ;;  %780 = vst [vmem:[%s1370_s23 + $0x1548] sm:$0xff] %v2407_v1 }
 0x16b   : > { %781 = vst [vmem:[%s1370_s23 + $0x1550] sm:$0xff] %v2407_v1  ;;  %782 = vst [vmem:[%s1370_s23 + $0x1558] sm:$0xff] %v2407_v1 }
 0x16c   : > { %783 = vst [vmem:[%s1370_s23 + $0x1560] sm:$0xff] %v2407_v1  ;;  %784 = vst [vmem:[%s1370_s23 + $0x1568] sm:$0xff] %v2407_v1 }
 0x16d   : > { %785 = vst [vmem:[%s1370_s23 + $0x1570] sm:$0xff] %v2407_v1  ;;  %786 = vst [vmem:[%s1370_s23 + $0x1578] sm:$0xff] %v2407_v1 }
 0x16e   : > { %787 = vst [vmem:[%s1370_s23 + $0x1580] sm:$0xff] %v2407_v1  ;;  %788 = vst [vmem:[%s1370_s23 + $0x1588] sm:$0xff] %v2407_v1 }
 0x16f   : > { %789 = vst [vmem:[%s1370_s23 + $0x1590] sm:$0xff] %v2407_v1  ;;  %790 = vst [vmem:[%s1370_s23 + $0x1598] sm:$0xff] %v2407_v1 }
 0x170   : > { %791 = vst [vmem:[%s1370_s23 + $0x15a0] sm:$0xff] %v2407_v1  ;;  %792 = vst [vmem:[%s1370_s23 + $0x15a8] sm:$0xff] %v2407_v1 }
 0x171   : > { %793 = vst [vmem:[%s1370_s23 + $0x15b0] sm:$0xff] %v2407_v1  ;;  %794 = vst [vmem:[%s1370_s23 + $0x15b8] sm:$0xff] %v2407_v1 }
 0x172   : > { %795 = vst [vmem:[%s1370_s23 + $0x15c0] sm:$0xff] %v2407_v1  ;;  %796 = vst [vmem:[%s1370_s23 + $0x15c8] sm:$0xff] %v2407_v1 }
 0x173   : > { %797 = vst [vmem:[%s1370_s23 + $0x15d0] sm:$0xff] %v2407_v1  ;;  %798 = vst [vmem:[%s1370_s23 + $0x15d8] sm:$0xff] %v2407_v1 }
 0x174   : > { %799 = vst [vmem:[%s1370_s23 + $0x15e0] sm:$0xff] %v2407_v1  ;;  %800 = vst [vmem:[%s1370_s23 + $0x15e8] sm:$0xff] %v2407_v1 }
 0x175   : > { %801 = vst [vmem:[%s1370_s23 + $0x15f0] sm:$0xff] %v2407_v1  ;;  %802 = vst [vmem:[%s1370_s23 + $0x15f8] sm:$0xff] %v2407_v1 }
 0x176   : > { %803 = vst [vmem:[%s1370_s23 + $0x1600] sm:$0xff] %v2407_v1  ;;  %804 = vst [vmem:[%s1370_s23 + $0x1608] sm:$0xff] %v2407_v1 }
 0x177   : > { %805 = vst [vmem:[%s1370_s23 + $0x1610] sm:$0xff] %v2407_v1  ;;  %806 = vst [vmem:[%s1370_s23 + $0x1618] sm:$0xff] %v2407_v1 }
 0x178   : > { %807 = vst [vmem:[%s1370_s23 + $0x1620] sm:$0xff] %v2407_v1  ;;  %808 = vst [vmem:[%s1370_s23 + $0x1628] sm:$0xff] %v2407_v1 }
 0x179   : > { %809 = vst [vmem:[%s1370_s23 + $0x1630] sm:$0xff] %v2407_v1  ;;  %810 = vst [vmem:[%s1370_s23 + $0x1638] sm:$0xff] %v2407_v1 }
 0x17a   : > { %811 = vst [vmem:[%s1370_s23 + $0x1640] sm:$0xff] %v2407_v1  ;;  %812 = vst [vmem:[%s1370_s23 + $0x1648] sm:$0xff] %v2407_v1 }
 0x17b   : > { %813 = vst [vmem:[%s1370_s23 + $0x1650] sm:$0xff] %v2407_v1  ;;  %814 = vst [vmem:[%s1370_s23 + $0x1658] sm:$0xff] %v2407_v1 }
 0x17c   : > { %815 = vst [vmem:[%s1370_s23 + $0x1660] sm:$0xff] %v2407_v1  ;;  %816 = vst [vmem:[%s1370_s23 + $0x1668] sm:$0xff] %v2407_v1 }
 0x17d   : > { %817 = vst [vmem:[%s1370_s23 + $0x1670] sm:$0xff] %v2407_v1  ;;  %818 = vst [vmem:[%s1370_s23 + $0x1678] sm:$0xff] %v2407_v1 }
 0x17e   : > { %819 = vst [vmem:[%s1370_s23 + $0x1680] sm:$0xff] %v2407_v1  ;;  %820 = vst [vmem:[%s1370_s23 + $0x1688] sm:$0xff] %v2407_v1 }
 0x17f   : > { %821 = vst [vmem:[%s1370_s23 + $0x1690] sm:$0xff] %v2407_v1  ;;  %822 = vst [vmem:[%s1370_s23 + $0x1698] sm:$0xff] %v2407_v1 }
 0x180   : > { %823 = vst [vmem:[%s1370_s23 + $0x16a0] sm:$0xff] %v2407_v1  ;;  %824 = vst [vmem:[%s1370_s23 + $0x16a8] sm:$0xff] %v2407_v1 }
 0x181   : > { %825 = vst [vmem:[%s1370_s23 + $0x16b0] sm:$0xff] %v2407_v1  ;;  %826 = vst [vmem:[%s1370_s23 + $0x16b8] sm:$0xff] %v2407_v1 }
 0x182   : > { %827 = vst [vmem:[%s1370_s23 + $0x16c0] sm:$0xff] %v2407_v1  ;;  %828 = vst [vmem:[%s1370_s23 + $0x16c8] sm:$0xff] %v2407_v1 }
 0x183   : > { %829 = vst [vmem:[%s1370_s23 + $0x16d0] sm:$0xff] %v2407_v1  ;;  %830 = vst [vmem:[%s1370_s23 + $0x16d8] sm:$0xff] %v2407_v1 }
 0x184   : > { %831 = vst [vmem:[%s1370_s23 + $0x16e0] sm:$0xff] %v2407_v1  ;;  %832 = vst [vmem:[%s1370_s23 + $0x16e8] sm:$0xff] %v2407_v1 }
 0x185   : > { %833 = vst [vmem:[%s1370_s23 + $0x16f0] sm:$0xff] %v2407_v1  ;;  %834 = vst [vmem:[%s1370_s23 + $0x16f8] sm:$0xff] %v2407_v1 }
 0x186   : > { %835 = vst [vmem:[%s1370_s23 + $0x1700] sm:$0xff] %v2407_v1  ;;  %836 = vst [vmem:[%s1370_s23 + $0x1708] sm:$0xff] %v2407_v1 }
 0x187   : > { %837 = vst [vmem:[%s1370_s23 + $0x1710] sm:$0xff] %v2407_v1  ;;  %838 = vst [vmem:[%s1370_s23 + $0x1718] sm:$0xff] %v2407_v1 }
 0x188   : > { %839 = vst [vmem:[%s1370_s23 + $0x1720] sm:$0xff] %v2407_v1  ;;  %840 = vst [vmem:[%s1370_s23 + $0x1728] sm:$0xff] %v2407_v1 }
 0x189   : > { %841 = vst [vmem:[%s1370_s23 + $0x1730] sm:$0xff] %v2407_v1  ;;  %842 = vst [vmem:[%s1370_s23 + $0x1738] sm:$0xff] %v2407_v1 }
 0x18a   : > { %843 = vst [vmem:[%s1370_s23 + $0x1740] sm:$0xff] %v2407_v1  ;;  %844 = vst [vmem:[%s1370_s23 + $0x1748] sm:$0xff] %v2407_v1 }
 0x18b   : > { %845 = vst [vmem:[%s1370_s23 + $0x1750] sm:$0xff] %v2407_v1  ;;  %846 = vst [vmem:[%s1370_s23 + $0x1758] sm:$0xff] %v2407_v1 }
 0x18c   : > { %847 = vst [vmem:[%s1370_s23 + $0x1760] sm:$0xff] %v2407_v1  ;;  %848 = vst [vmem:[%s1370_s23 + $0x1768] sm:$0xff] %v2407_v1 }
 0x18d   : > { %849 = vst [vmem:[%s1370_s23 + $0x1770] sm:$0xff] %v2407_v1  ;;  %850 = vst [vmem:[%s1370_s23 + $0x1778] sm:$0xff] %v2407_v1 }
 0x18e   : > { %851 = vst [vmem:[%s1370_s23 + $0x1780] sm:$0xff] %v2407_v1  ;;  %852 = vst [vmem:[%s1370_s23 + $0x1788] sm:$0xff] %v2407_v1 }
 0x18f   : > { %853 = vst [vmem:[%s1370_s23 + $0x1790] sm:$0xff] %v2407_v1  ;;  %854 = vst [vmem:[%s1370_s23 + $0x1798] sm:$0xff] %v2407_v1 }
 0x190   : > { %855 = vst [vmem:[%s1370_s23 + $0x17a0] sm:$0xff] %v2407_v1  ;;  %856 = vst [vmem:[%s1370_s23 + $0x17a8] sm:$0xff] %v2407_v1 }
 0x191   : > { %857 = vst [vmem:[%s1370_s23 + $0x17b0] sm:$0xff] %v2407_v1  ;;  %858 = vst [vmem:[%s1370_s23 + $0x17b8] sm:$0xff] %v2407_v1 }
 0x192   : > { %859 = vst [vmem:[%s1370_s23 + $0x17c0] sm:$0xff] %v2407_v1  ;;  %860 = vst [vmem:[%s1370_s23 + $0x17c8] sm:$0xff] %v2407_v1 }
 0x193   : > { %861 = vst [vmem:[%s1370_s23 + $0x17d0] sm:$0xff] %v2407_v1  ;;  %862 = vst [vmem:[%s1370_s23 + $0x17d8] sm:$0xff] %v2407_v1 }
 0x194   : > { %863 = vst [vmem:[%s1370_s23 + $0x17e0] sm:$0xff] %v2407_v1  ;;  %864 = vst [vmem:[%s1370_s23 + $0x17e8] sm:$0xff] %v2407_v1 }
 0x195   : > { %865 = vst [vmem:[%s1370_s23 + $0x17f0] sm:$0xff] %v2407_v1  ;;  %866 = vst [vmem:[%s1370_s23 + $0x17f8] sm:$0xff] %v2407_v1 }
 0x196   : > { %867 = vst [vmem:[%s1370_s23 + $0x1800] sm:$0xff] %v2407_v1  ;;  %868 = vst [vmem:[%s1370_s23 + $0x1808] sm:$0xff] %v2407_v1 }
 0x197   : > { %869 = vst [vmem:[%s1370_s23 + $0x1810] sm:$0xff] %v2407_v1  ;;  %870 = vst [vmem:[%s1370_s23 + $0x1818] sm:$0xff] %v2407_v1 }
 0x198   : > { %871 = vst [vmem:[%s1370_s23 + $0x1820] sm:$0xff] %v2407_v1  ;;  %872 = vst [vmem:[%s1370_s23 + $0x1828] sm:$0xff] %v2407_v1 }
 0x199   : > { %873 = vst [vmem:[%s1370_s23 + $0x1830] sm:$0xff] %v2407_v1  ;;  %874 = vst [vmem:[%s1370_s23 + $0x1838] sm:$0xff] %v2407_v1 }
 0x19a   : > { %875 = vst [vmem:[%s1370_s23 + $0x1840] sm:$0xff] %v2407_v1  ;;  %876 = vst [vmem:[%s1370_s23 + $0x1848] sm:$0xff] %v2407_v1 }
 0x19b   : > { %877 = vst [vmem:[%s1370_s23 + $0x1850] sm:$0xff] %v2407_v1  ;;  %878 = vst [vmem:[%s1370_s23 + $0x1858] sm:$0xff] %v2407_v1 }
 0x19c   : > { %879 = vst [vmem:[%s1370_s23 + $0x1860] sm:$0xff] %v2407_v1  ;;  %880 = vst [vmem:[%s1370_s23 + $0x1868] sm:$0xff] %v2407_v1 }
 0x19d   : > { %881 = vst [vmem:[%s1370_s23 + $0x1870] sm:$0xff] %v2407_v1  ;;  %882 = vst [vmem:[%s1370_s23 + $0x1878] sm:$0xff] %v2407_v1 }
 0x19e   : > { %883 = vst [vmem:[%s1370_s23 + $0x1880] sm:$0xff] %v2407_v1  ;;  %884 = vst [vmem:[%s1370_s23 + $0x1888] sm:$0xff] %v2407_v1 }
 0x19f   : > { %885 = vst [vmem:[%s1370_s23 + $0x1890] sm:$0xff] %v2407_v1  ;;  %886 = vst [vmem:[%s1370_s23 + $0x1898] sm:$0xff] %v2407_v1 }
 0x1a0   : > { %887 = vst [vmem:[%s1370_s23 + $0x18a0] sm:$0xff] %v2407_v1  ;;  %888 = vst [vmem:[%s1370_s23 + $0x18a8] sm:$0xff] %v2407_v1 }
 0x1a1   : > { %889 = vst [vmem:[%s1370_s23 + $0x18b0] sm:$0xff] %v2407_v1  ;;  %890 = vst [vmem:[%s1370_s23 + $0x18b8] sm:$0xff] %v2407_v1 }
 0x1a2   : > { %891 = vst [vmem:[%s1370_s23 + $0x18c0] sm:$0xff] %v2407_v1  ;;  %892 = vst [vmem:[%s1370_s23 + $0x18c8] sm:$0xff] %v2407_v1 }
 0x1a3   : > { %893 = vst [vmem:[%s1370_s23 + $0x18d0] sm:$0xff] %v2407_v1  ;;  %894 = vst [vmem:[%s1370_s23 + $0x18d8] sm:$0xff] %v2407_v1 }
 0x1a4   : > { %895 = vst [vmem:[%s1370_s23 + $0x18e0] sm:$0xff] %v2407_v1  ;;  %896 = vst [vmem:[%s1370_s23 + $0x18e8] sm:$0xff] %v2407_v1 }
 0x1a5   : > { %897 = vst [vmem:[%s1370_s23 + $0x18f0] sm:$0xff] %v2407_v1  ;;  %898 = vst [vmem:[%s1370_s23 + $0x18f8] sm:$0xff] %v2407_v1 }
 0x1a6   : > { %899 = vst [vmem:[%s1370_s23 + $0x1900] sm:$0xff] %v2407_v1  ;;  %900 = vst [vmem:[%s1370_s23 + $0x1908] sm:$0xff] %v2407_v1 }
 0x1a7   : > { %901 = vst [vmem:[%s1370_s23 + $0x1910] sm:$0xff] %v2407_v1  ;;  %902 = vst [vmem:[%s1370_s23 + $0x1918] sm:$0xff] %v2407_v1 }
 0x1a8   : > { %903 = vst [vmem:[%s1370_s23 + $0x1920] sm:$0xff] %v2407_v1  ;;  %904 = vst [vmem:[%s1370_s23 + $0x1928] sm:$0xff] %v2407_v1 }
 0x1a9   : > { %905 = vst [vmem:[%s1370_s23 + $0x1930] sm:$0xff] %v2407_v1  ;;  %906 = vst [vmem:[%s1370_s23 + $0x1938] sm:$0xff] %v2407_v1 }
 0x1aa   : > { %907 = vst [vmem:[%s1370_s23 + $0x1940] sm:$0xff] %v2407_v1  ;;  %908 = vst [vmem:[%s1370_s23 + $0x1948] sm:$0xff] %v2407_v1 }
 0x1ab   : > { %909 = vst [vmem:[%s1370_s23 + $0x1950] sm:$0xff] %v2407_v1  ;;  %910 = vst [vmem:[%s1370_s23 + $0x1958] sm:$0xff] %v2407_v1 }
 0x1ac   : > { %911 = vst [vmem:[%s1370_s23 + $0x1960] sm:$0xff] %v2407_v1  ;;  %912 = vst [vmem:[%s1370_s23 + $0x1968] sm:$0xff] %v2407_v1 }
 0x1ad   : > { %913 = vst [vmem:[%s1370_s23 + $0x1970] sm:$0xff] %v2407_v1  ;;  %914 = vst [vmem:[%s1370_s23 + $0x1978] sm:$0xff] %v2407_v1 }
 0x1ae   : > { %915 = vst [vmem:[%s1370_s23 + $0x1980] sm:$0xff] %v2407_v1  ;;  %916 = vst [vmem:[%s1370_s23 + $0x1988] sm:$0xff] %v2407_v1 }
 0x1af   : > { %917 = vst [vmem:[%s1370_s23 + $0x1990] sm:$0xff] %v2407_v1  ;;  %918 = vst [vmem:[%s1370_s23 + $0x1998] sm:$0xff] %v2407_v1 }
 0x1b0   : > { %919 = vst [vmem:[%s1370_s23 + $0x19a0] sm:$0xff] %v2407_v1  ;;  %920 = vst [vmem:[%s1370_s23 + $0x19a8] sm:$0xff] %v2407_v1 }
 0x1b1   : > { %921 = vst [vmem:[%s1370_s23 + $0x19b0] sm:$0xff] %v2407_v1  ;;  %922 = vst [vmem:[%s1370_s23 + $0x19b8] sm:$0xff] %v2407_v1 }
 0x1b2   : > { %923 = vst [vmem:[%s1370_s23 + $0x19c0] sm:$0xff] %v2407_v1  ;;  %924 = vst [vmem:[%s1370_s23 + $0x19c8] sm:$0xff] %v2407_v1 }
 0x1b3   : > { %925 = vst [vmem:[%s1370_s23 + $0x19d0] sm:$0xff] %v2407_v1  ;;  %926 = vst [vmem:[%s1370_s23 + $0x19d8] sm:$0xff] %v2407_v1 }
 0x1b4   : > { %927 = vst [vmem:[%s1370_s23 + $0x19e0] sm:$0xff] %v2407_v1  ;;  %928 = vst [vmem:[%s1370_s23 + $0x19e8] sm:$0xff] %v2407_v1 }
 0x1b5   : > { %929 = vst [vmem:[%s1370_s23 + $0x19f0] sm:$0xff] %v2407_v1  ;;  %930 = vst [vmem:[%s1370_s23 + $0x19f8] sm:$0xff] %v2407_v1 }
 0x1b6   : > { %931 = vst [vmem:[%s1370_s23 + $0x1a00] sm:$0xff] %v2407_v1  ;;  %932 = vst [vmem:[%s1370_s23 + $0x1a08] sm:$0xff] %v2407_v1 }
 0x1b7   : > { %933 = vst [vmem:[%s1370_s23 + $0x1a10] sm:$0xff] %v2407_v1  ;;  %934 = vst [vmem:[%s1370_s23 + $0x1a18] sm:$0xff] %v2407_v1 }
 0x1b8   : > { %935 = vst [vmem:[%s1370_s23 + $0x1a20] sm:$0xff] %v2407_v1  ;;  %936 = vst [vmem:[%s1370_s23 + $0x1a28] sm:$0xff] %v2407_v1 }
 0x1b9   : > { %937 = vst [vmem:[%s1370_s23 + $0x1a30] sm:$0xff] %v2407_v1  ;;  %938 = vst [vmem:[%s1370_s23 + $0x1a38] sm:$0xff] %v2407_v1 }
 0x1ba   : > { %939 = vst [vmem:[%s1370_s23 + $0x1a40] sm:$0xff] %v2407_v1  ;;  %940 = vst [vmem:[%s1370_s23 + $0x1a48] sm:$0xff] %v2407_v1 }
 0x1bb   : > { %941 = vst [vmem:[%s1370_s23 + $0x1a50] sm:$0xff] %v2407_v1  ;;  %942 = vst [vmem:[%s1370_s23 + $0x1a58] sm:$0xff] %v2407_v1 }
 0x1bc   : > { %943 = vst [vmem:[%s1370_s23 + $0x1a60] sm:$0xff] %v2407_v1  ;;  %944 = vst [vmem:[%s1370_s23 + $0x1a68] sm:$0xff] %v2407_v1 }
 0x1bd   : > { %945 = vst [vmem:[%s1370_s23 + $0x1a70] sm:$0xff] %v2407_v1  ;;  %946 = vst [vmem:[%s1370_s23 + $0x1a78] sm:$0xff] %v2407_v1 }
 0x1be   : > { %947 = vst [vmem:[%s1370_s23 + $0x1a80] sm:$0xff] %v2407_v1  ;;  %948 = vst [vmem:[%s1370_s23 + $0x1a88] sm:$0xff] %v2407_v1 }
 0x1bf   : > { %949 = vst [vmem:[%s1370_s23 + $0x1a90] sm:$0xff] %v2407_v1  ;;  %950 = vst [vmem:[%s1370_s23 + $0x1a98] sm:$0xff] %v2407_v1 }
 0x1c0   : > { %951 = vst [vmem:[%s1370_s23 + $0x1aa0] sm:$0xff] %v2407_v1  ;;  %952 = vst [vmem:[%s1370_s23 + $0x1aa8] sm:$0xff] %v2407_v1 }
 0x1c1   : > { %953 = vst [vmem:[%s1370_s23 + $0x1ab0] sm:$0xff] %v2407_v1  ;;  %954 = vst [vmem:[%s1370_s23 + $0x1ab8] sm:$0xff] %v2407_v1 }
 0x1c2   : > { %955 = vst [vmem:[%s1370_s23 + $0x1ac0] sm:$0xff] %v2407_v1  ;;  %956 = vst [vmem:[%s1370_s23 + $0x1ac8] sm:$0xff] %v2407_v1 }
 0x1c3   : > { %957 = vst [vmem:[%s1370_s23 + $0x1ad0] sm:$0xff] %v2407_v1  ;;  %958 = vst [vmem:[%s1370_s23 + $0x1ad8] sm:$0xff] %v2407_v1 }
 0x1c4   : > { %959 = vst [vmem:[%s1370_s23 + $0x1ae0] sm:$0xff] %v2407_v1  ;;  %960 = vst [vmem:[%s1370_s23 + $0x1ae8] sm:$0xff] %v2407_v1 }
 0x1c5   : > { %961 = vst [vmem:[%s1370_s23 + $0x1af0] sm:$0xff] %v2407_v1  ;;  %962 = vst [vmem:[%s1370_s23 + $0x1af8] sm:$0xff] %v2407_v1 }
 0x1c6   : > { %963 = vst [vmem:[%s1370_s23 + $0x1b00] sm:$0xff] %v2407_v1  ;;  %964 = vst [vmem:[%s1370_s23 + $0x1b08] sm:$0xff] %v2407_v1 }
 0x1c7   : > { %965 = vst [vmem:[%s1370_s23 + $0x1b10] sm:$0xff] %v2407_v1  ;;  %966 = vst [vmem:[%s1370_s23 + $0x1b18] sm:$0xff] %v2407_v1 }
 0x1c8   : > { %967 = vst [vmem:[%s1370_s23 + $0x1b20] sm:$0xff] %v2407_v1  ;;  %968 = vst [vmem:[%s1370_s23 + $0x1b28] sm:$0xff] %v2407_v1 }
 0x1c9   : > { %969 = vst [vmem:[%s1370_s23 + $0x1b30] sm:$0xff] %v2407_v1  ;;  %970 = vst [vmem:[%s1370_s23 + $0x1b38] sm:$0xff] %v2407_v1 }
 0x1ca   : > { %971 = vst [vmem:[%s1370_s23 + $0x1b40] sm:$0xff] %v2407_v1  ;;  %972 = vst [vmem:[%s1370_s23 + $0x1b48] sm:$0xff] %v2407_v1 }
 0x1cb   : > { %973 = vst [vmem:[%s1370_s23 + $0x1b50] sm:$0xff] %v2407_v1  ;;  %974 = vst [vmem:[%s1370_s23 + $0x1b58] sm:$0xff] %v2407_v1 }
 0x1cc   : > { %975 = vst [vmem:[%s1370_s23 + $0x1b60] sm:$0xff] %v2407_v1  ;;  %976 = vst [vmem:[%s1370_s23 + $0x1b68] sm:$0xff] %v2407_v1 }
 0x1cd   : > { %977 = vst [vmem:[%s1370_s23 + $0x1b70] sm:$0xff] %v2407_v1  ;;  %978 = vst [vmem:[%s1370_s23 + $0x1b78] sm:$0xff] %v2407_v1 }
 0x1ce   : > { %979 = vst [vmem:[%s1370_s23 + $0x1b80] sm:$0xff] %v2407_v1  ;;  %980 = vst [vmem:[%s1370_s23 + $0x1b88] sm:$0xff] %v2407_v1 }
 0x1cf   : > { %981 = vst [vmem:[%s1370_s23 + $0x1b90] sm:$0xff] %v2407_v1  ;;  %982 = vst [vmem:[%s1370_s23 + $0x1b98] sm:$0xff] %v2407_v1 }
 0x1d0   : > { %983 = vst [vmem:[%s1370_s23 + $0x1ba0] sm:$0xff] %v2407_v1  ;;  %984 = vst [vmem:[%s1370_s23 + $0x1ba8] sm:$0xff] %v2407_v1 }
 0x1d1   : > { %985 = vst [vmem:[%s1370_s23 + $0x1bb0] sm:$0xff] %v2407_v1  ;;  %986 = vst [vmem:[%s1370_s23 + $0x1bb8] sm:$0xff] %v2407_v1 }
 0x1d2   : > { %987 = vst [vmem:[%s1370_s23 + $0x1bc0] sm:$0xff] %v2407_v1  ;;  %988 = vst [vmem:[%s1370_s23 + $0x1bc8] sm:$0xff] %v2407_v1 }
 0x1d3   : > { %989 = vst [vmem:[%s1370_s23 + $0x1bd0] sm:$0xff] %v2407_v1  ;;  %990 = vst [vmem:[%s1370_s23 + $0x1bd8] sm:$0xff] %v2407_v1 }
 0x1d4   : > { %991 = vst [vmem:[%s1370_s23 + $0x1be0] sm:$0xff] %v2407_v1  ;;  %992 = vst [vmem:[%s1370_s23 + $0x1be8] sm:$0xff] %v2407_v1 }
 0x1d5   : > { %993 = vst [vmem:[%s1370_s23 + $0x1bf0] sm:$0xff] %v2407_v1  ;;  %994 = vst [vmem:[%s1370_s23 + $0x1bf8] sm:$0xff] %v2407_v1 }
 0x1d6   : > { %995 = vst [vmem:[%s1370_s23 + $0x1c00] sm:$0xff] %v2407_v1  ;;  %996 = vst [vmem:[%s1370_s23 + $0x1c08] sm:$0xff] %v2407_v1 }
 0x1d7   : > { %997 = vst [vmem:[%s1370_s23 + $0x1c10] sm:$0xff] %v2407_v1  ;;  %998 = vst [vmem:[%s1370_s23 + $0x1c18] sm:$0xff] %v2407_v1 }
 0x1d8   : > { %999 = vst [vmem:[%s1370_s23 + $0x1c20] sm:$0xff] %v2407_v1  ;;  %1000 = vst [vmem:[%s1370_s23 + $0x1c28] sm:$0xff] %v2407_v1 }
 0x1d9   : > { %1001 = vst [vmem:[%s1370_s23 + $0x1c30] sm:$0xff] %v2407_v1  ;;  %1002 = vst [vmem:[%s1370_s23 + $0x1c38] sm:$0xff] %v2407_v1 }
 0x1da   : > { %1003 = vst [vmem:[%s1370_s23 + $0x1c40] sm:$0xff] %v2407_v1  ;;  %1004 = vst [vmem:[%s1370_s23 + $0x1c48] sm:$0xff] %v2407_v1 }
 0x1db   : > { %1005 = vst [vmem:[%s1370_s23 + $0x1c50] sm:$0xff] %v2407_v1  ;;  %1006 = vst [vmem:[%s1370_s23 + $0x1c58] sm:$0xff] %v2407_v1 }
 0x1dc   : > { %1007 = vst [vmem:[%s1370_s23 + $0x1c60] sm:$0xff] %v2407_v1  ;;  %1008 = vst [vmem:[%s1370_s23 + $0x1c68] sm:$0xff] %v2407_v1 }
 0x1dd   : > { %1009 = vst [vmem:[%s1370_s23 + $0x1c70] sm:$0xff] %v2407_v1  ;;  %1010 = vst [vmem:[%s1370_s23 + $0x1c78] sm:$0xff] %v2407_v1 }
 0x1de   : > { %1011 = vst [vmem:[%s1370_s23 + $0x1c80] sm:$0xff] %v2407_v1  ;;  %1012 = vst [vmem:[%s1370_s23 + $0x1c88] sm:$0xff] %v2407_v1 }
 0x1df   : > { %1013 = vst [vmem:[%s1370_s23 + $0x1c90] sm:$0xff] %v2407_v1  ;;  %1014 = vst [vmem:[%s1370_s23 + $0x1c98] sm:$0xff] %v2407_v1 }
 0x1e0   : > { %1015 = vst [vmem:[%s1370_s23 + $0x1ca0] sm:$0xff] %v2407_v1  ;;  %1016 = vst [vmem:[%s1370_s23 + $0x1ca8] sm:$0xff] %v2407_v1 }
 0x1e1   : > { %1017 = vst [vmem:[%s1370_s23 + $0x1cb0] sm:$0xff] %v2407_v1  ;;  %1018 = vst [vmem:[%s1370_s23 + $0x1cb8] sm:$0xff] %v2407_v1 }
 0x1e2   : > { %1019 = vst [vmem:[%s1370_s23 + $0x1cc0] sm:$0xff] %v2407_v1  ;;  %1020 = vst [vmem:[%s1370_s23 + $0x1cc8] sm:$0xff] %v2407_v1 }
 0x1e3   : > { %1021 = vst [vmem:[%s1370_s23 + $0x1cd0] sm:$0xff] %v2407_v1  ;;  %1022 = vst [vmem:[%s1370_s23 + $0x1cd8] sm:$0xff] %v2407_v1 }
 0x1e4   : > { %1023 = vst [vmem:[%s1370_s23 + $0x1ce0] sm:$0xff] %v2407_v1  ;;  %1024 = vst [vmem:[%s1370_s23 + $0x1ce8] sm:$0xff] %v2407_v1 }
 0x1e5   : > { %1025 = vst [vmem:[%s1370_s23 + $0x1cf0] sm:$0xff] %v2407_v1  ;;  %1026 = vst [vmem:[%s1370_s23 + $0x1cf8] sm:$0xff] %v2407_v1 }
 0x1e6   : > { %1027 = vst [vmem:[%s1370_s23 + $0x1d00] sm:$0xff] %v2407_v1  ;;  %1028 = vst [vmem:[%s1370_s23 + $0x1d08] sm:$0xff] %v2407_v1 }
 0x1e7   : > { %1029 = vst [vmem:[%s1370_s23 + $0x1d10] sm:$0xff] %v2407_v1  ;;  %1030 = vst [vmem:[%s1370_s23 + $0x1d18] sm:$0xff] %v2407_v1 }
 0x1e8   : > { %1031 = vst [vmem:[%s1370_s23 + $0x1d20] sm:$0xff] %v2407_v1  ;;  %1032 = vst [vmem:[%s1370_s23 + $0x1d28] sm:$0xff] %v2407_v1 }
 0x1e9   : > { %1033 = vst [vmem:[%s1370_s23 + $0x1d30] sm:$0xff] %v2407_v1  ;;  %1034 = vst [vmem:[%s1370_s23 + $0x1d38] sm:$0xff] %v2407_v1 }
 0x1ea   : > { %1035 = vst [vmem:[%s1370_s23 + $0x1d40] sm:$0xff] %v2407_v1  ;;  %1036 = vst [vmem:[%s1370_s23 + $0x1d48] sm:$0xff] %v2407_v1 }
 0x1eb   : > { %1037 = vst [vmem:[%s1370_s23 + $0x1d50] sm:$0xff] %v2407_v1  ;;  %1038 = vst [vmem:[%s1370_s23 + $0x1d58] sm:$0xff] %v2407_v1 }
 0x1ec   : > { %1039 = vst [vmem:[%s1370_s23 + $0x1d60] sm:$0xff] %v2407_v1  ;;  %1040 = vst [vmem:[%s1370_s23 + $0x1d68] sm:$0xff] %v2407_v1 }
 0x1ed   : > { %1041 = vst [vmem:[%s1370_s23 + $0x1d70] sm:$0xff] %v2407_v1  ;;  %1042 = vst [vmem:[%s1370_s23 + $0x1d78] sm:$0xff] %v2407_v1 }
 0x1ee   : > { %1043 = vst [vmem:[%s1370_s23 + $0x1d80] sm:$0xff] %v2407_v1  ;;  %1044 = vst [vmem:[%s1370_s23 + $0x1d88] sm:$0xff] %v2407_v1 }
 0x1ef   : > { %1045 = vst [vmem:[%s1370_s23 + $0x1d90] sm:$0xff] %v2407_v1  ;;  %1046 = vst [vmem:[%s1370_s23 + $0x1d98] sm:$0xff] %v2407_v1 }
 0x1f0   : > { %1047 = vst [vmem:[%s1370_s23 + $0x1da0] sm:$0xff] %v2407_v1  ;;  %1048 = vst [vmem:[%s1370_s23 + $0x1da8] sm:$0xff] %v2407_v1 }
 0x1f1   : > { %1049 = vst [vmem:[%s1370_s23 + $0x1db0] sm:$0xff] %v2407_v1  ;;  %1050 = vst [vmem:[%s1370_s23 + $0x1db8] sm:$0xff] %v2407_v1 }
 0x1f2   : > { %1051 = vst [vmem:[%s1370_s23 + $0x1dc0] sm:$0xff] %v2407_v1  ;;  %1052 = vst [vmem:[%s1370_s23 + $0x1dc8] sm:$0xff] %v2407_v1 }
 0x1f3   : > { %1053 = vst [vmem:[%s1370_s23 + $0x1dd0] sm:$0xff] %v2407_v1  ;;  %1054 = vst [vmem:[%s1370_s23 + $0x1dd8] sm:$0xff] %v2407_v1 }
 0x1f4   : > { %1055 = vst [vmem:[%s1370_s23 + $0x1de0] sm:$0xff] %v2407_v1  ;;  %1056 = vst [vmem:[%s1370_s23 + $0x1de8] sm:$0xff] %v2407_v1 }
 0x1f5   : > { %1057 = vst [vmem:[%s1370_s23 + $0x1df0] sm:$0xff] %v2407_v1  ;;  %1058 = vst [vmem:[%s1370_s23 + $0x1df8] sm:$0xff] %v2407_v1 }
 0x1f6   : > { %1059 = vst [vmem:[%s1370_s23 + $0x1e00] sm:$0xff] %v2407_v1  ;;  %1060 = vst [vmem:[%s1370_s23 + $0x1e08] sm:$0xff] %v2407_v1 }
 0x1f7   : > { %1061 = vst [vmem:[%s1370_s23 + $0x1e10] sm:$0xff] %v2407_v1  ;;  %1062 = vst [vmem:[%s1370_s23 + $0x1e18] sm:$0xff] %v2407_v1 }
 0x1f8   : > { %1063 = vst [vmem:[%s1370_s23 + $0x1e20] sm:$0xff] %v2407_v1  ;;  %1064 = vst [vmem:[%s1370_s23 + $0x1e28] sm:$0xff] %v2407_v1 }
 0x1f9   : > { %1065 = vst [vmem:[%s1370_s23 + $0x1e30] sm:$0xff] %v2407_v1  ;;  %1066 = vst [vmem:[%s1370_s23 + $0x1e38] sm:$0xff] %v2407_v1 }
 0x1fa   : > { %1067 = vst [vmem:[%s1370_s23 + $0x1e40] sm:$0xff] %v2407_v1  ;;  %1068 = vst [vmem:[%s1370_s23 + $0x1e48] sm:$0xff] %v2407_v1 }
 0x1fb   : > { %1069 = vst [vmem:[%s1370_s23 + $0x1e50] sm:$0xff] %v2407_v1  ;;  %1070 = vst [vmem:[%s1370_s23 + $0x1e58] sm:$0xff] %v2407_v1 }
 0x1fc   : > { %1071 = vst [vmem:[%s1370_s23 + $0x1e60] sm:$0xff] %v2407_v1  ;;  %1072 = vst [vmem:[%s1370_s23 + $0x1e68] sm:$0xff] %v2407_v1 }
 0x1fd   : > { %1073 = vst [vmem:[%s1370_s23 + $0x1e70] sm:$0xff] %v2407_v1  ;;  %1074 = vst [vmem:[%s1370_s23 + $0x1e78] sm:$0xff] %v2407_v1 }
 0x1fe   : > { %1075 = vst [vmem:[%s1370_s23 + $0x1e80] sm:$0xff] %v2407_v1  ;;  %1076 = vst [vmem:[%s1370_s23 + $0x1e88] sm:$0xff] %v2407_v1 }
 0x1ff   : > { %1077 = vst [vmem:[%s1370_s23 + $0x1e90] sm:$0xff] %v2407_v1  ;;  %1078 = vst [vmem:[%s1370_s23 + $0x1e98] sm:$0xff] %v2407_v1 }
 0x200   : > { %1079 = vst [vmem:[%s1370_s23 + $0x1ea0] sm:$0xff] %v2407_v1  ;;  %1080 = vst [vmem:[%s1370_s23 + $0x1ea8] sm:$0xff] %v2407_v1 }
 0x201   : > { %1081 = vst [vmem:[%s1370_s23 + $0x1eb0] sm:$0xff] %v2407_v1  ;;  %1082 = vst [vmem:[%s1370_s23 + $0x1eb8] sm:$0xff] %v2407_v1 }
 0x202   : > { %1083 = vst [vmem:[%s1370_s23 + $0x1ec0] sm:$0xff] %v2407_v1  ;;  %1084 = vst [vmem:[%s1370_s23 + $0x1ec8] sm:$0xff] %v2407_v1 }
 0x203   : > { %1085 = vst [vmem:[%s1370_s23 + $0x1ed0] sm:$0xff] %v2407_v1  ;;  %1086 = vst [vmem:[%s1370_s23 + $0x1ed8] sm:$0xff] %v2407_v1 }
 0x204   : > { %1087 = vst [vmem:[%s1370_s23 + $0x1ee0] sm:$0xff] %v2407_v1  ;;  %1088 = vst [vmem:[%s1370_s23 + $0x1ee8] sm:$0xff] %v2407_v1 }
 0x205   : > { %1089 = vst [vmem:[%s1370_s23 + $0x1ef0] sm:$0xff] %v2407_v1  ;;  %1090 = vst [vmem:[%s1370_s23 + $0x1ef8] sm:$0xff] %v2407_v1 }
 0x206   : > { %1091 = vst [vmem:[%s1370_s23 + $0x1f00] sm:$0xff] %v2407_v1  ;;  %1092 = vst [vmem:[%s1370_s23 + $0x1f08] sm:$0xff] %v2407_v1 }
 0x207   : > { %1093 = vst [vmem:[%s1370_s23 + $0x1f10] sm:$0xff] %v2407_v1  ;;  %1094 = vst [vmem:[%s1370_s23 + $0x1f18] sm:$0xff] %v2407_v1 }
 0x208   : > { %1095 = vst [vmem:[%s1370_s23 + $0x1f20] sm:$0xff] %v2407_v1  ;;  %1096 = vst [vmem:[%s1370_s23 + $0x1f28] sm:$0xff] %v2407_v1 }
 0x209   : > { %1097 = vst [vmem:[%s1370_s23 + $0x1f30] sm:$0xff] %v2407_v1  ;;  %1098 = vst [vmem:[%s1370_s23 + $0x1f38] sm:$0xff] %v2407_v1 }
 0x20a   : > { %1099 = vst [vmem:[%s1370_s23 + $0x1f40] sm:$0xff] %v2407_v1  ;;  %1100 = vst [vmem:[%s1370_s23 + $0x1f48] sm:$0xff] %v2407_v1 }
 0x20b   : > { %1101 = vst [vmem:[%s1370_s23 + $0x1f50] sm:$0xff] %v2407_v1  ;;  %1102 = vst [vmem:[%s1370_s23 + $0x1f58] sm:$0xff] %v2407_v1 }
 0x20c   : > { %1103 = vst [vmem:[%s1370_s23 + $0x1f60] sm:$0xff] %v2407_v1  ;;  %1104 = vst [vmem:[%s1370_s23 + $0x1f68] sm:$0xff] %v2407_v1 }
 0x20d   : > { %1105 = vst [vmem:[%s1370_s23 + $0x1f70] sm:$0xff] %v2407_v1  ;;  %1106 = vst [vmem:[%s1370_s23 + $0x1f78] sm:$0xff] %v2407_v1 }
 0x20e   : > { %1107 = vst [vmem:[%s1370_s23 + $0x1f80] sm:$0xff] %v2407_v1  ;;  %1108 = vst [vmem:[%s1370_s23 + $0x1f88] sm:$0xff] %v2407_v1 }
 0x20f   : > { %1109 = vst [vmem:[%s1370_s23 + $0x1f90] sm:$0xff] %v2407_v1  ;;  %1110 = vst [vmem:[%s1370_s23 + $0x1f98] sm:$0xff] %v2407_v1 }
 0x210   : > { %1111 = vst [vmem:[%s1370_s23 + $0x1fa0] sm:$0xff] %v2407_v1  ;;  %1112 = vst [vmem:[%s1370_s23 + $0x1fa8] sm:$0xff] %v2407_v1 }
 0x211   : > { %1113 = vst [vmem:[%s1370_s23 + $0x1fb0] sm:$0xff] %v2407_v1  ;;  %1114 = vst [vmem:[%s1370_s23 + $0x1fb8] sm:$0xff] %v2407_v1 }
 0x212   : > { %1115 = vst [vmem:[%s1370_s23 + $0x1fc0] sm:$0xff] %v2407_v1  ;;  %1116 = vst [vmem:[%s1370_s23 + $0x1fc8] sm:$0xff] %v2407_v1 }
 0x213   : > { %1117 = vst [vmem:[%s1370_s23 + $0x1fd0] sm:$0xff] %v2407_v1  ;;  %1118 = vst [vmem:[%s1370_s23 + $0x1fd8] sm:$0xff] %v2407_v1 }
 0x214   : > { %1119 = vst [vmem:[%s1370_s23 + $0x1fe0] sm:$0xff] %v2407_v1  ;;  %1120 = vst [vmem:[%s1370_s23 + $0x1fe8] sm:$0xff] %v2407_v1 }
 0x215   : > { %1121 = vst [vmem:[%s1370_s23 + $0x1ff0] sm:$0xff] %v2407_v1  ;;  %1122 = vst [vmem:[%s1370_s23 + $0x1ff8] sm:$0xff] %v2407_v1 }
 0x216   : > { %1255 = shalt.err (!%p1252_p2)
}
 0x217   : > { %s1256_s4 = scalar_lea.hbm %s1376_s27, 131072  ;;  %s1260_s7 = scalar_lea.hbm %s3477_s1, 524288 }
 0x218   : > { %p1257_p3 = scmp.ne.s32.totalorder %s1376_s27, %s1256_s4  ;;  %p1261_p8 = scmp.lt.u32.totalorder %s1376_s27, %s3477_s1 }
 0x219   : > { %p1262_p9 = scmp.lt.u32.totalorder %s1260_s7, %s1256_s4  ;;  %p1264_p11 = scmp.lt.u32.totalorder %s1256_s4, %s1376_s27 }
 0x21a   : > { %p1258_p4 = pnand %p1257_p3, %p1357_p5 }
 0x21b   : > { %p1263_p10 = por %p1262_p9, %p1261_p8 }
 0x21c   : > { %p1259_p7 = pneg %p1258_p4 }
 0x21d   : > { %p1265_p12 = por %p1264_p11, %p1263_p10 }
 0x21f   : > { %p1266_p13 = pnand %p1265_p12, %p1259_p7 }
 0x221   : > { %1269 = shalt.err (!%p1266_p13)
}
 0x222   : > { %s1307_s14 = smov 2048   ;;  %s1308_s15 = smov 128  }
 0x223   : > { %1200 = dma.vmem_to_hbm [thread:$0]  (%p1357_p5), %s1378_s24, 131072, %s1376_s27, %s3435_s28, %s1307_s14, %s1307_s14, %s1308_s15  }
 0x224 PF: > { %p1206_p0 = scmp.ge.s32.totalorder %s1304_s11, 2  ;;  %s1153_s19 = sand.u32 1, %s1292_s8  }
 0x225   : > { %s1154_s20 = scalar_lea.sflag [#allocation4], %s1153_s19 }
 0x226   : > { %p1203_p1 = pnand %p1206_p0, %p1361_p6 }
 0x228   : > { %1287 = dma.done.wait (!%p1203_p1), %s1154_s20, 131072  }
 0x229   : > { %1289 = vsyncadd (!%p1203_p1), %s1154_s20, 4294836224  ;;  %p12_p2 = scmp.ge.s32.totalorder %s1345_s13, 6   ;;  %s3480_s8 = smov %s1296_s9 }
 0x22a   : > { %s3481_s9 = smov %s1300_s10  ;;  %s3482_s10 = smov %s1355_s16 }
 0x22b   : > { %s3483_s11 = smov %s1345_s13  ;;  %14 = sbr.rel (!%p12_p2) target bundleno = 5 (0x5), region = 56 }
 0x232   :  { %1159 = vsyncpa [#allocation4], 1 }
 0x233   :  { %1161 = vsyncpa [#allocation4 + $0x1], 1 }

</bundles_post_ra>
